<compile_context>
chip_gen: v7x
topology: tpu7x:2x2x1
jax: 0.10.0
libtpu: 0.0.40
codegen_flags: <defaults>
</compile_context>

<pallas_src>
import jax
import jax.numpy as jnp
from jax.experimental import pallas as pl
from jax.experimental.pallas import tpu as pltpu

_IN_FEATS = 28 * 28          # 784
_K_PAD = 896                 # 7 * 128, lane-aligned K for the first matmul
_OUT_FEATS = 64
_OUT_PAD = 128               # lane-dense output slab; slice [:, :64] outside

_INV_SQRT2 = 0.7071067811865476


def _round_up(x, m):
    return ((x + m - 1) // m) * m


def _gelu_exact(x):
    # nn.GELU() default is the exact erf-based formulation; computed in f32.
    return 0.5 * x * (1.0 + jax.lax.erf(x * _INV_SQRT2))


def mlp_encoder_kernel(x_ref,
                       w1_ref, b1_ref,
                       w2_ref, b2_ref,
                       w3_ref, b3_ref,
                       w4_ref, b4_ref,
                       o_ref):
    """One batch tile through the whole 4-layer MLP (weights resident in VMEM)."""
    # Layer 1: bf16 x bf16 -> f32 accumulate, bias + GELU in f32.
    h = jnp.dot(x_ref[...], w1_ref[...], preferred_element_type=jnp.float32)
    h = _gelu_exact(h + b1_ref[...])

    # Layer 2
    h = jnp.dot(h.astype(jnp.bfloat16), w2_ref[...],
                preferred_element_type=jnp.float32)
    h = _gelu_exact(h + b2_ref[...])

    # Layer 3
    h = jnp.dot(h.astype(jnp.bfloat16), w3_ref[...],
                preferred_element_type=jnp.float32)
    h = _gelu_exact(h + b3_ref[...])

    # Layer 4 (no activation); output lanes padded to 128.
    h = jnp.dot(h.astype(jnp.bfloat16), w4_ref[...],
                preferred_element_type=jnp.float32)
    o_ref[...] = (h + b4_ref[...]).astype(o_ref.dtype)


def mlp_encoder_forward(x_nchw, params, *, tb_max=256):
    """x_nchw: (B, 1, 28, 28) float32. Returns (B, 64) float32."""
    B = x_nchw.shape[0]
    x = x_nchw.reshape(B, -1)                      # Flatten(1,-1) -> (B, 784)

    (w1, b1), (w2, b2), (w3, b3), (w4, b4) = params

    # --- layout / padding plumbing (wrapper side) -------------------------
    # Batch tile: multiple of 16 (bf16 sublane packing), capped at tb_max.
    TB = min(tb_max, _round_up(B, 16))
    B_pad = _round_up(B, TB)

    x = jnp.pad(x, ((0, B_pad - B), (0, _K_PAD - _IN_FEATS))).astype(jnp.bfloat16)

    w1p = jnp.pad(w1, ((0, _K_PAD - _IN_FEATS), (0, 0))).astype(jnp.bfloat16)
    w2p = w2.astype(jnp.bfloat16)
    w3p = w3.astype(jnp.bfloat16)
    w4p = jnp.pad(w4, ((0, 0), (0, _OUT_PAD - _OUT_FEATS))).astype(jnp.bfloat16)
    b4p = jnp.pad(b4, ((0, 0), (0, _OUT_PAD - _OUT_FEATS)))

    grid = (B_pad // TB,)
    const2 = lambda i: (0, 0)   # weights/biases: same block every step -> resident

    out = pl.pallas_call(
        mlp_encoder_kernel,
        out_shape=jax.ShapeDtypeStruct((B_pad, _OUT_PAD), jnp.float32),
        grid=grid,
        in_specs=[
            pl.BlockSpec((TB, _K_PAD), lambda i: (i, 0)),       # x tile
            pl.BlockSpec(w1p.shape, const2), pl.BlockSpec(b1.shape, const2),
            pl.BlockSpec(w2p.shape, const2), pl.BlockSpec(b2.shape, const2),
            pl.BlockSpec(w3p.shape, const2), pl.BlockSpec(b3.shape, const2),
            pl.BlockSpec(w4p.shape, const2), pl.BlockSpec(b4p.shape, const2),
        ],
        out_specs=pl.BlockSpec((TB, _OUT_PAD), lambda i: (i, 0)),
        compiler_params=pltpu.CompilerParams(
            dimension_semantics=("parallel",),   # megacore sharding on v7x
            vmem_limit_bytes=32 << 20,           # ~1.2MB weights + tiles << 32MiB
        ),
    )(x, w1p, b1, w2p, b2, w3p, b3, w4p, b4p)

    return out[:B, :_OUT_FEATS]


def init_params(key):
    """Deterministic synthetic init matching the module's shapes.

    Linear weights ~ N(0, 0.01) as in weights_init(); biases set to zero
    (synthetic deterministic choice; PyTorch default bias init is uniform).
    """
    dims = [(_IN_FEATS, 512), (512, 256), (256, 128), (128, _OUT_FEATS)]
    params = []
    for (din, dout) in dims:
        key, sub = jax.random.split(key)
        # stored as [in, out] (transpose of PyTorch's [out, in])
        w = (0.01 * jax.random.normal(sub, (din, dout))).astype(jnp.float32)
        b = jnp.zeros((1, dout), jnp.float32)   # 2-D so it lives cleanly in VMEM
        params.append((w, b))
    return params


def reference_forward(x_nchw, params):
    """Pure-JAX reference with matching bf16-input / f32-accumulate semantics."""
    h = x_nchw.reshape(x_nchw.shape[0], -1)

    def layer(h, w, b, act):
        y = jnp.dot(h.astype(jnp.bfloat16), w.astype(jnp.bfloat16),
                    preferred_element_type=jnp.float32) + b
        return _gelu_exact(y) if act else y

    (w1, b1), (w2, b2), (w3, b3), (w4, b4) = params
    h = layer(h, w1, b1, True)
    h = layer(h, w2, b2, True)
    h = layer(h, w3, b3, True)
    return layer(h, w4, b4, False)


if __name__ == "__main__":
    key = jax.random.PRNGKey(0)
    kx, kp = jax.random.split(key)

    B = 2
    x = jax.random.normal(kx, (B, 1, 28, 28), dtype=jnp.float32)   # NCHW input
    params = init_params(kp)

    out = mlp_encoder_forward(x, params)
    out = jax.block_until_ready(out)

    ref = reference_forward(x, params)
    assert out.shape == (B, _OUT_FEATS), out.shape
    assert jnp.allclose(out, ref, atol=1e-3, rtol=1e-2), "mismatch vs. JAX reference"

    print("KERNEL_OK")
</pallas_src>

<mosaic_0001>
module attributes {stable_mosaic.version = 11 : i64} {
  func.func @mlp_encoder_kernel(%arg0: i32, %arg1: memref<16x896xbf16, #tpu.memory_space<vmem>>, %arg2: memref<896x512xbf16, #tpu.memory_space<vmem>>, %arg3: memref<1x512xf32, #tpu.memory_space<vmem>>, %arg4: memref<512x256xbf16, #tpu.memory_space<vmem>>, %arg5: memref<1x256xf32, #tpu.memory_space<vmem>>, %arg6: memref<256x128xbf16, #tpu.memory_space<vmem>>, %arg7: memref<1x128xf32, #tpu.memory_space<vmem>>, %arg8: memref<128x128xbf16, #tpu.memory_space<vmem>>, %arg9: memref<1x128xf32, #tpu.memory_space<vmem>>, %arg10: memref<16x128xf32, #tpu.memory_space<vmem>>) attributes {dimension_semantics = [#tpu.dimension_semantics<parallel>], iteration_bounds = array<i64: 1>, scalar_prefetch = 0 : i64, scratch_operands = 0 : i64, tpu.core_type = #tpu.core_type<tc>, window_params = [{transform_indices = @transform_0, window_bounds = array<i64: 16, 896>}, {pipeline_mode = #tpu.pipeline_mode<synchronous>, transform_indices = @transform_1, window_bounds = array<i64: 896, 512>}, {pipeline_mode = #tpu.pipeline_mode<synchronous>, transform_indices = @transform_2, window_bounds = array<i64: 1, 512>}, {pipeline_mode = #tpu.pipeline_mode<synchronous>, transform_indices = @transform_3, window_bounds = array<i64: 512, 256>}, {pipeline_mode = #tpu.pipeline_mode<synchronous>, transform_indices = @transform_4, window_bounds = array<i64: 1, 256>}, {pipeline_mode = #tpu.pipeline_mode<synchronous>, transform_indices = @transform_5, window_bounds = array<i64: 256, 128>}, {pipeline_mode = #tpu.pipeline_mode<synchronous>, transform_indices = @transform_6, window_bounds = array<i64: 1, 128>}, {pipeline_mode = #tpu.pipeline_mode<synchronous>, transform_indices = @transform_7, window_bounds = array<i64: 128, 128>}, {pipeline_mode = #tpu.pipeline_mode<synchronous>, transform_indices = @transform_8, window_bounds = array<i64: 1, 128>}, {transform_indices = @transform_9, window_bounds = array<i64: 16, 128>}]} {
    %c0 = arith.constant 0 : index
    %c0_0 = arith.constant 0 : index
    %0 = vector.load %arg1[%c0, %c0_0] : memref<16x896xbf16, #tpu.memory_space<vmem>>, vector<16x896xbf16>
    %c0_1 = arith.constant 0 : index
    %c0_2 = arith.constant 0 : index
    %1 = vector.load %arg2[%c0_1, %c0_2] : memref<896x512xbf16, #tpu.memory_space<vmem>>, vector<896x512xbf16>
    %cst = arith.constant dense<0.000000e+00> : vector<16x512xf32>
    %2 = tpu.matmul %0, %1, %cst {dimension_numbers = #tpu.dot_dimension_numbers<[1], [0], [0], [1], [0, 0, 1, 1], [], []>} : vector<16x896xbf16>, vector<896x512xbf16>, vector<16x512xf32> -> vector<16x512xf32>
    %c0_3 = arith.constant 0 : index
    %c0_4 = arith.constant 0 : index
    %3 = vector.load %arg3[%c0_3, %c0_4] : memref<1x512xf32, #tpu.memory_space<vmem>>, vector<1x512xf32>
    %4 = vector.broadcast %3 : vector<1x512xf32> to vector<16x512xf32>
    %5 = arith.addf %2, %4 : vector<16x512xf32>
    %cst_5 = arith.constant 5.000000e-01 : f32
    %6 = vector.broadcast %cst_5 : f32 to vector<16x512xf32>
    %7 = arith.mulf %6, %5 : vector<16x512xf32>
    %cst_6 = arith.constant 0.707106769 : f32
    %8 = vector.broadcast %cst_6 : f32 to vector<16x512xf32>
    %9 = arith.mulf %5, %8 : vector<16x512xf32>
    %10 = math.erf %9 : vector<16x512xf32>
    %cst_7 = arith.constant 1.000000e+00 : f32
    %11 = vector.broadcast %cst_7 : f32 to vector<16x512xf32>
    %12 = arith.addf %11, %10 : vector<16x512xf32>
    %13 = arith.mulf %7, %12 : vector<16x512xf32>
    %14 = arith.truncf %13 : vector<16x512xf32> to vector<16x512xbf16>
    %c0_8 = arith.constant 0 : index
    %c0_9 = arith.constant 0 : index
    %15 = vector.load %arg4[%c0_8, %c0_9] : memref<512x256xbf16, #tpu.memory_space<vmem>>, vector<512x256xbf16>
    %cst_10 = arith.constant dense<0.000000e+00> : vector<16x256xf32>
    %16 = tpu.matmul %14, %15, %cst_10 {dimension_numbers = #tpu.dot_dimension_numbers<[1], [0], [0], [1], [0, 0, 1, 1], [], []>} : vector<16x512xbf16>, vector<512x256xbf16>, vector<16x256xf32> -> vector<16x256xf32>
    %c0_11 = arith.constant 0 : index
    %c0_12 = arith.constant 0 : index
    %17 = vector.load %arg5[%c0_11, %c0_12] : memref<1x256xf32, #tpu.memory_space<vmem>>, vector<1x256xf32>
    %18 = vector.broadcast %17 : vector<1x256xf32> to vector<16x256xf32>
    %19 = arith.addf %16, %18 : vector<16x256xf32>
    %cst_13 = arith.constant 5.000000e-01 : f32
    %20 = vector.broadcast %cst_13 : f32 to vector<16x256xf32>
    %21 = arith.mulf %20, %19 : vector<16x256xf32>
    %cst_14 = arith.constant 0.707106769 : f32
    %22 = vector.broadcast %cst_14 : f32 to vector<16x256xf32>
    %23 = arith.mulf %19, %22 : vector<16x256xf32>
    %24 = math.erf %23 : vector<16x256xf32>
    %cst_15 = arith.constant 1.000000e+00 : f32
    %25 = vector.broadcast %cst_15 : f32 to vector<16x256xf32>
    %26 = arith.addf %25, %24 : vector<16x256xf32>
    %27 = arith.mulf %21, %26 : vector<16x256xf32>
    %28 = arith.truncf %27 : vector<16x256xf32> to vector<16x256xbf16>
    %c0_16 = arith.constant 0 : index
    %c0_17 = arith.constant 0 : index
    %29 = vector.load %arg6[%c0_16, %c0_17] : memref<256x128xbf16, #tpu.memory_space<vmem>>, vector<256x128xbf16>
    %cst_18 = arith.constant dense<0.000000e+00> : vector<16x128xf32>
    %30 = tpu.matmul %28, %29, %cst_18 {dimension_numbers = #tpu.dot_dimension_numbers<[1], [0], [0], [1], [0, 0, 1, 1], [], []>} : vector<16x256xbf16>, vector<256x128xbf16>, vector<16x128xf32> -> vector<16x128xf32>
    %c0_19 = arith.constant 0 : index
    %c0_20 = arith.constant 0 : index
    %31 = vector.load %arg7[%c0_19, %c0_20] : memref<1x128xf32, #tpu.memory_space<vmem>>, vector<1x128xf32>
    %32 = vector.broadcast %31 : vector<1x128xf32> to vector<16x128xf32>
    %33 = arith.addf %30, %32 : vector<16x128xf32>
    %cst_21 = arith.constant 5.000000e-01 : f32
    %34 = vector.broadcast %cst_21 : f32 to vector<16x128xf32>
    %35 = arith.mulf %34, %33 : vector<16x128xf32>
    %cst_22 = arith.constant 0.707106769 : f32
    %36 = vector.broadcast %cst_22 : f32 to vector<16x128xf32>
    %37 = arith.mulf %33, %36 : vector<16x128xf32>
    %38 = math.erf %37 : vector<16x128xf32>
    %cst_23 = arith.constant 1.000000e+00 : f32
    %39 = vector.broadcast %cst_23 : f32 to vector<16x128xf32>
    %40 = arith.addf %39, %38 : vector<16x128xf32>
    %41 = arith.mulf %35, %40 : vector<16x128xf32>
    %42 = arith.truncf %41 : vector<16x128xf32> to vector<16x128xbf16>
    %c0_24 = arith.constant 0 : index
    %c0_25 = arith.constant 0 : index
    %43 = vector.load %arg8[%c0_24, %c0_25] : memref<128x128xbf16, #tpu.memory_space<vmem>>, vector<128x128xbf16>
    %cst_26 = arith.constant dense<0.000000e+00> : vector<16x128xf32>
    %44 = tpu.matmul %42, %43, %cst_26 {dimension_numbers = #tpu.dot_dimension_numbers<[1], [0], [0], [1], [0, 0, 1, 1], [], []>} : vector<16x128xbf16>, vector<128x128xbf16>, vector<16x128xf32> -> vector<16x128xf32>
    %c0_27 = arith.constant 0 : index
    %c0_28 = arith.constant 0 : index
    %45 = vector.load %arg9[%c0_27, %c0_28] : memref<1x128xf32, #tpu.memory_space<vmem>>, vector<1x128xf32>
    %46 = vector.broadcast %45 : vector<1x128xf32> to vector<16x128xf32>
    %47 = arith.addf %44, %46 : vector<16x128xf32>
    %c0_29 = arith.constant 0 : index
    %c0_30 = arith.constant 0 : index
    %48 = vector.load %arg10[%c0_29, %c0_30] : memref<16x128xf32, #tpu.memory_space<vmem>>, vector<16x128xf32>
    tpu.vector_store %arg10[%c0_29, %c0_30], %47 {strides = array<i32>} : memref<16x128xf32, #tpu.memory_space<vmem>>, vector<16x128xf32>,
    return
  }
  func.func @transform_0(%arg0: i32) -> (i32, i32) {
    %c0_i32 = arith.constant 0 : i32
    %c0_i32_0 = arith.constant 0 : i32
    return %arg0, %c0_i32 : i32, i32
  }
  func.func @transform_1(%arg0: i32) -> (i32, i32) {
    %c0_i32 = arith.constant 0 : i32
    %c0_i32_0 = arith.constant 0 : i32
    %c0_i32_1 = arith.constant 0 : i32
    return %c0_i32, %c0_i32_0 : i32, i32
  }
  func.func @transform_2(%arg0: i32) -> (i32, i32) {
    %c0_i32 = arith.constant 0 : i32
    %c0_i32_0 = arith.constant 0 : i32
    %c0_i32_1 = arith.constant 0 : i32
    return %c0_i32, %c0_i32_0 : i32, i32
  }
  func.func @transform_3(%arg0: i32) -> (i32, i32) {
    %c0_i32 = arith.constant 0 : i32
    %c0_i32_0 = arith.constant 0 : i32
    %c0_i32_1 = arith.constant 0 : i32
    return %c0_i32, %c0_i32_0 : i32, i32
  }
  func.func @transform_4(%arg0: i32) -> (i32, i32) {
    %c0_i32 = arith.constant 0 : i32
    %c0_i32_0 = arith.constant 0 : i32
    %c0_i32_1 = arith.constant 0 : i32
    return %c0_i32, %c0_i32_0 : i32, i32
  }
  func.func @transform_5(%arg0: i32) -> (i32, i32) {
    %c0_i32 = arith.constant 0 : i32
    %c0_i32_0 = arith.constant 0 : i32
    %c0_i32_1 = arith.constant 0 : i32
    return %c0_i32, %c0_i32_0 : i32, i32
  }
  func.func @transform_6(%arg0: i32) -> (i32, i32) {
    %c0_i32 = arith.constant 0 : i32
    %c0_i32_0 = arith.constant 0 : i32
    %c0_i32_1 = arith.constant 0 : i32
    return %c0_i32, %c0_i32_0 : i32, i32
  }
  func.func @transform_7(%arg0: i32) -> (i32, i32) {
    %c0_i32 = arith.constant 0 : i32
    %c0_i32_0 = arith.constant 0 : i32
    %c0_i32_1 = arith.constant 0 : i32
    return %c0_i32, %c0_i32_0 : i32, i32
  }
  func.func @transform_8(%arg0: i32) -> (i32, i32) {
    %c0_i32 = arith.constant 0 : i32
    %c0_i32_0 = arith.constant 0 : i32
    %c0_i32_1 = arith.constant 0 : i32
    return %c0_i32, %c0_i32_0 : i32, i32
  }
  func.func @transform_9(%arg0: i32) -> (i32, i32) {
    %c0_i32 = arith.constant 0 : i32
    %c0_i32_0 = arith.constant 0 : i32
    return %arg0, %c0_i32 : i32, i32
  }
}

</mosaic_0001>

<bundles_post_ra>
// kernel: tpu_custom_call.1
= control target key start
LH: loop header
LB: loop body
LE: loop exit
PB: predicated region body
PF: predicated region fallthrough
CT: control target
= control target key end

     0   :  { %14 = vsyncpa [#allocation3], 0  ;;  %s4004_s0 = inlined_call_operand.hbm [shape: bf16[16,896], index: 0, kind: input, shape index: {}]   ;;  %s4005_s1 = inlined_call_operand.hbm [shape: bf16[896,512], index: 1, kind: input, shape index: {}]   ;;  %s4006_s2 = inlined_call_operand.vmem [shape: f32[1,512], index: 2, kind: input, shape index: {}]   ;;  %s4007_s3 = inlined_call_operand.hbm [shape: bf16[512,256], index: 3, kind: input, shape index: {}]   ;;  %s4008_s4 = inlined_call_operand.vmem [shape: f32[1,256], index: 4, kind: input, shape index: {}]   ;;  %s4009_s5 = inlined_call_operand.hbm [shape: bf16[256,128], index: 5, kind: input, shape index: {}]   ;;  %s4010_s6 = inlined_call_operand.vmem [shape: f32[1,128], index: 6, kind: input, shape index: {}]   ;;  %s4011_s7 = inlined_call_operand.hbm [shape: bf16[128,128], index: 7, kind: input, shape index: {}]   ;;  %s4012_s8 = inlined_call_operand.vmem [shape: f32[1,128], index: 8, kind: input, shape index: {}]   ;;  %s4013_s9 = inlined_call_operand.hbm [shape: f32[16,128], index: 9, kind: output, shape index: {}]  }
   0x1   :  { %15 = vsyncpa [#allocation6], 0 }
   0x2   :  { %16 = vsyncpa [#allocation9], 0 }
   0x3   :  { %17 = vsyncpa [#allocation4], 0  ;;  %s3788_s30 = smov [#allocation5]   ;;  %s3648_s13 = scalar_lea.hbm %s4005_s1, 28672 }
   0x4   :  { %s35_s10 = sshll.u32 %s3788_s30, 4  ;;  %p3649_p0 = scmp.ne.s32.totalorder %s4005_s1, %s3648_s13  ;;  %s36_s10 = int_to_ptr.vmem [resolvable:$true] %s35_s10 }
   0x5   :  { %p3652_p1 = scmp.lt.u32.totalorder %s3648_s13, %s4005_s1 }
   0x7   :  { %p3654_p2 = pnand %p3652_p1, %p3649_p0 }
   0x9   :  { %3657 = shalt.err (!%p3654_p2)
}
   0xa   :  { %s3658_s18 = scalar_lea.vmem %s36_s10, 28672  ;;  %p3663_p4 = scmp.lt.s32.totalorder %s36_s10, %s36_s10 }
   0xb   :  { %p3659_p3 = scmp.ne.s32.totalorder %s36_s10, %s3658_s18  ;;  %p3664_p5 = scmp.lt.s32.totalorder %s3658_s18, %s3658_s18 }
   0xd   :  { %p3665_p6 = por %p3664_p5, %p3663_p4 }
   0xf   :  { %p3666_p7 = pnand %p3665_p6, %p3659_p3 }
  0x11   :  { %3669 = shalt.err (!%p3666_p7)
}
  0x12   :  { %s3789_s19 = smov 256   ;;  %s3790_s20 = smov 16  }
  0x13   :  { %41 = dma.hbm_to_vmem [thread:$0]  %s4005_s1, 28672, %s36_s10, [#allocation6], %s3789_s19, %s3789_s19, %s3790_s20  }
  0x14   :  { %s3791_s23 = smov [#allocation8]   ;;  %s3670_s27 = scalar_lea.hbm %s4009_s5, 2048 }
  0x15   :  { %s63_s24 = sshll.u32 %s3791_s23, 4  ;;  %p3671_p8 = scmp.ne.s32.totalorder %s4009_s5, %s3670_s27  ;;  %s64_s24 = int_to_ptr.vmem [resolvable:$true] %s63_s24 }
  0x16   :  { %p3674_p9 = scmp.lt.u32.totalorder %s3670_s27, %s4009_s5 }
  0x18   :  { %p3676_p10 = pnand %p3674_p9, %p3671_p8 }
  0x1a   :  { %3679 = shalt.err (!%p3676_p10)
}
  0x1b   :  { %s3680_s12 = scalar_lea.vmem %s64_s24, 2048  ;;  %p3685_p12 = scmp.lt.s32.totalorder %s64_s24, %s64_s24 }
  0x1c   :  { %p3681_p11 = scmp.ne.s32.totalorder %s64_s24, %s3680_s12  ;;  %p3686_p13 = scmp.lt.s32.totalorder %s3680_s12, %s3680_s12 }
  0x1e   :  { %p3687_p0 = por %p3686_p13, %p3685_p12 }
  0x20   :  { %p3688_p1 = pnand %p3687_p0, %p3681_p11 }
  0x22   :  { %3691 = shalt.err (!%p3688_p1)
}
  0x23   :  { %s3792_s1 = smov 64   ;;  %s3793_s10 = smov 4  }
  0x24   :  { %69 = dma.hbm_to_vmem [thread:$0]  %s4009_s5, 2048, %s64_s24, [#allocation9], %s3792_s1, %s3792_s1, %s3793_s10  }
  0x25   :  { %s3794_s15 = smov [#allocation2]   ;;  %s3692_s19 = scalar_lea.hbm %s4004_s0, 896 }
  0x26   :  { %s23_s16 = sshll.u32 %s3794_s15, 4  ;;  %p3693_p2 = scmp.ne.s32.totalorder %s4004_s0, %s3692_s19  ;;  %s24_s16 = int_to_ptr.vmem [resolvable:$true] %s23_s16 }
  0x27   :  { %p3696_p3 = scmp.lt.u32.totalorder %s3692_s19, %s4004_s0 }
  0x29   :  { %p3698_p4 = pnand %p3696_p3, %p3693_p2 }
  0x2b   :  { %3701 = shalt.err (!%p3698_p4)
}
  0x2c   :  { %s3702_s25 = scalar_lea.vmem %s24_s16, 896  ;;  %p3707_p6 = scmp.lt.s32.totalorder %s24_s16, %s24_s16 }
  0x2d   :  { %p3703_p5 = scmp.ne.s32.totalorder %s24_s16, %s3702_s25  ;;  %p3708_p7 = scmp.lt.s32.totalorder %s3702_s25, %s3702_s25 }
  0x2f   :  { %p3709_p8 = por %p3708_p7, %p3707_p6 }
  0x31   :  { %p3710_p9 = pnand %p3709_p8, %p3703_p5 }
  0x33   :  { %3713 = shalt.err (!%p3710_p9)
}
  0x34   :  { %s3795_s5 = smov 448   ;;  %s3796_s24 = smov 28  }
  0x35   :  { %29 = dma.hbm_to_vmem [thread:$0]  %s4004_s0, 896, %s24_s16, [#allocation3], %s3795_s5, %s3795_s5, %s3796_s24  }
  0x36   :  { %s3797_s28 = smov [#allocation7]   ;;  %s3714_s12 = scalar_lea.hbm %s4007_s3, 8192 }
  0x37   :  { %s49_s29 = sshll.u32 %s3797_s28, 4  ;;  %p3715_p10 = scmp.ne.s32.totalorder %s4007_s3, %s3714_s12  ;;  %s50_s29 = int_to_ptr.vmem [resolvable:$true] %s49_s29 }
  0x38   :  { %p3718_p11 = scmp.lt.u32.totalorder %s3714_s12, %s4007_s3 }
  0x3a   :  { %p3720_p12 = pnand %p3718_p11, %p3715_p10 }
  0x3c   :  { %3723 = shalt.err (!%p3720_p12)
}
  0x3d   :  { %s3724_s18 = scalar_lea.vmem %s50_s29, 8192  ;;  %p3729_p0 = scmp.lt.s32.totalorder %s50_s29, %s50_s29 }
  0x3e   :  { %p3725_p13 = scmp.ne.s32.totalorder %s50_s29, %s3724_s18  ;;  %p3730_p1 = scmp.lt.s32.totalorder %s3724_s18, %s3724_s18 }
  0x40   :  { %p3731_p2 = por %p3730_p1, %p3729_p0 }
  0x42   :  { %p3732_p3 = pnand %p3731_p2, %p3725_p13 }
  0x44   :  { %3735 = shalt.err (!%p3732_p3)
}
  0x45   :  { %s3798_s0 = smov 128   ;;  %s3799_s16 = smov 8  }
  0x46   :  { %55 = dma.hbm_to_vmem [thread:$0]  %s4007_s3, 8192, %s50_s29, [#allocation6], %s3798_s0, %s3798_s0, %s3799_s16  }
  0x47   :  { %s3800_s21 = smov [#allocation10]   ;;  %s3736_s5 = scalar_lea.hbm %s4011_s7, 1024 }
  0x48   :  { %s77_s22 = sshll.u32 %s3800_s21, 4  ;;  %p3737_p4 = scmp.ne.s32.totalorder %s4011_s7, %s3736_s5  ;;  %s78_s22 = int_to_ptr.vmem [resolvable:$true] %s77_s22 }
  0x49   :  { %p3740_p5 = scmp.lt.u32.totalorder %s3736_s5, %s4011_s7 }
  0x4b   :  { %p3742_p6 = pnand %p3740_p5, %p3737_p4 }
  0x4d   :  { %3745 = shalt.err (!%p3742_p6)
}
  0x4e   :  { %s3746_s30 = scalar_lea.vmem %s78_s22, 1024  ;;  %p3751_p8 = scmp.lt.s32.totalorder %s78_s22, %s78_s22 }
  0x4f   :  { %p3747_p7 = scmp.ne.s32.totalorder %s78_s22, %s3746_s30  ;;  %p3752_p9 = scmp.lt.s32.totalorder %s3746_s30, %s3746_s30 }
  0x51   :  { %p3753_p10 = por %p3752_p9, %p3751_p8 }
  0x53   :  { %p3754_p11 = pnand %p3753_p10, %p3747_p7 }
  0x55   :  { %3757 = shalt.err (!%p3754_p11)
}
  0x56   :  { %83 = dma.hbm_to_vmem [thread:$0]  %s4011_s7, 1024, %s78_s22, [#allocation9], %s3792_s1, %s3792_s1, %s3793_s10  }
  0x57   :  { %3780 = dma.done.wait [#allocation3], 896  }
  0x58   :  { %3781 = vsyncadd [#allocation3], 4294966400 }
  0x59   :  { %3782 = dma.done.wait [#allocation6], 36864  }
  0x5a   :  { %3783 = vsyncadd [#allocation6], 4294930432 }
  0x5b   :  { %3784 = dma.done.wait [#allocation9], 3072  }
  0x5c   :  { %3785 = vsyncadd [#allocation9], 4294964224  ;;  %v3801_v0 = vmov 0   ;;  %v3153_v1 = vld [vmem:[#allocation5 + $0x4] ss:$16 sps:$4 sm:$0xff]   ;;  %vm3803_vm0 = vmmov 0  }
  0x5d   :  { %1673 = vmatprep.mubr.bf16.mxu1 %v3801_v0  ;;  %v3155_v2 = vld [vmem:[#allocation5 + $0x604] ss:$16 sps:$4 sm:$0xff]   ;;  %1512 = vmatprep.subr.bf16.mxu0 %v3153_v1  ;;  %v3157_v3 = vld [vmem:[#allocation5] ss:$16 sps:$4 sm:$0xff]   ;;  %v3206_v34 = vld [vmem:[#allocation5 + $0xc] ss:$16 sps:$4 sm:$0xff]  }
  0x5e   :  { %v3158_v4 = vld [vmem:[#allocation5 + $0x600] ss:$16 sps:$4 sm:$0xff]   ;;  %1641 = vmatprep.subr.bf16.mxu1 %v3155_v2  ;;  %v3159_v5 = vld [vmem:[#allocation5 + $0x24] ss:$16 sps:$4 sm:$0xff]   ;;  %1513 = vmatpush1.bf16.msra.mxu0 %v3157_v3  ;;  %v3204_v36 = vld [vmem:[#allocation5 + $0x8] ss:$16 sps:$4 sm:$0xff]  }
  0x5f   :  { %1642 = vmatpush1.bf16.msra.mxu1 %v3158_v4  ;;  %v3161_v6 = vld [vmem:[#allocation5 + $0x624] ss:$16 sps:$4 sm:$0xff]   ;;  %v3163_v7 = vld [vmem:[#allocation5 + $0x20] ss:$16 sps:$4 sm:$0xff]   ;;  %1514 = vmatprep.subr.bf16.mxu0 %v3159_v5  ;;  %v3212_v39 = vld [vmem:[#allocation5 + $0x2c] ss:$16 sps:$4 sm:$0xff]  }
  0x60   :  { %v3164_v8 = vld [vmem:[#allocation5 + $0x620] ss:$16 sps:$4 sm:$0xff]   ;;  %1643 = vmatprep.subr.bf16.mxu1 %v3161_v6  ;;  %v3165_v9 = vld [vmem:[#allocation5 + $0x44] ss:$16 sps:$4 sm:$0xff]   ;;  %v3210_v40 = vld [vmem:[#allocation5 + $0x28] ss:$16 sps:$4 sm:$0xff]  }
  0x61   :  { %v3167_v10 = vld [vmem:[#allocation5 + $0x644] ss:$16 sps:$4 sm:$0xff]   ;;  %v3169_v11 = vld [vmem:[#allocation5 + $0x40] ss:$16 sps:$4 sm:$0xff]   ;;  %v3218_v43 = vld [vmem:[#allocation5 + $0x4c] ss:$16 sps:$4 sm:$0xff]  }
  0x62   :  { %v3170_v12 = vld [vmem:[#allocation5 + $0x640] ss:$16 sps:$4 sm:$0xff]   ;;  %1515 = vmatpush1.bf16.msra.mxu0 %v3163_v7  ;;  %v3171_v13 = vld [vmem:[#allocation5 + $0x64] ss:$16 sps:$4 sm:$0xff]   ;;  %v3216_v44 = vld [vmem:[#allocation5 + $0x48] ss:$16 sps:$4 sm:$0xff]  }
  0x63   :  { %1644 = vmatpush1.bf16.msra.mxu1 %v3164_v8  ;;  %1516 = vmatprep.subr.bf16.mxu0 %v3165_v9  ;;  %v3173_v14 = vld [vmem:[#allocation5 + $0x664] ss:$16 sps:$4 sm:$0xff]   ;;  %v3175_v15 = vld [vmem:[#allocation5 + $0x60] ss:$16 sps:$4 sm:$0xff]   ;;  %v3224_v47 = vld [vmem:[#allocation5 + $0x6c] ss:$16 sps:$4 sm:$0xff]  }
  0x64   :  { %1645 = vmatprep.subr.bf16.mxu1 %v3167_v10  ;;  %v3176_v16 = vld [vmem:[#allocation5 + $0x660] ss:$16 sps:$4 sm:$0xff]   ;;  %v3177_v17 = vld [vmem:[#allocation5 + $0x84] ss:$16 sps:$4 sm:$0xff]   ;;  %v3222_v48 = vld [vmem:[#allocation5 + $0x68] ss:$16 sps:$4 sm:$0xff]  }
  0x65   :  { %v3179_v18 = vld [vmem:[#allocation5 + $0x684] ss:$16 sps:$4 sm:$0xff]   ;;  %v3181_v19 = vld [vmem:[#allocation5 + $0x80] ss:$16 sps:$4 sm:$0xff]   ;;  %v3252_v51 = vld [vmem:[#allocation2 + $0x4] ss:$28 sps:$4 sm:$0xff]  }
  0x66   :  { %1517 = vmatpush1.bf16.msra.mxu0 %v3169_v11  ;;  %v3182_v20 = vld [vmem:[#allocation5 + $0x680] ss:$16 sps:$4 sm:$0xff]   ;;  %v3183_v21 = vld [vmem:[#allocation5 + $0xa4] ss:$16 sps:$4 sm:$0xff]   ;;  %v3230_v52 = vld [vmem:[#allocation5 + $0x8c] ss:$16 sps:$4 sm:$0xff]   ;;  %1544 = vmatprep.mubr.bf16.mxu0 %v3252_v51 }
  0x67   :  { %1646 = vmatpush1.bf16.msra.mxu1 %v3170_v12  ;;  %1518 = vmatprep.subr.bf16.mxu0 %v3171_v13  ;;  %v3185_v22 = vld [vmem:[#allocation5 + $0x6a4] ss:$16 sps:$4 sm:$0xff]   ;;  %v3187_v23 = vld [vmem:[#allocation5 + $0xa0] ss:$16 sps:$4 sm:$0xff]   ;;  %v3228_v53 = vld [vmem:[#allocation5 + $0x88] ss:$16 sps:$4 sm:$0xff]  }
  0x68   :  { %1647 = vmatprep.subr.bf16.mxu1 %v3173_v14  ;;  %v3188_v24 = vld [vmem:[#allocation5 + $0x6a0] ss:$16 sps:$4 sm:$0xff]   ;;  %v3189_v25 = vld [vmem:[#allocation5 + $0xc4] ss:$16 sps:$4 sm:$0xff]   ;;  %v3236_v56 = vld [vmem:[#allocation5 + $0xac] ss:$16 sps:$4 sm:$0xff]  }
  0x69   :  { %v3191_v26 = vld [vmem:[#allocation5 + $0x6c4] ss:$16 sps:$4 sm:$0xff]   ;;  %v3193_v27 = vld [vmem:[#allocation5 + $0xc0] ss:$16 sps:$4 sm:$0xff]   ;;  %v3234_v57 = vld [vmem:[#allocation5 + $0xa8] ss:$16 sps:$4 sm:$0xff]  }
  0x6a   :  { %1519 = vmatpush1.bf16.msra.mxu0 %v3175_v15  ;;  %v3194_v28 = vld [vmem:[#allocation5 + $0x6c0] ss:$16 sps:$4 sm:$0xff]   ;;  %v3195_v29 = vld [vmem:[#allocation5 + $0xe4] ss:$16 sps:$4 sm:$0xff]   ;;  %v3242_v60 = vld [vmem:[#allocation5 + $0xcc] ss:$16 sps:$4 sm:$0xff]  }
  0x6b   :  { %1648 = vmatpush1.bf16.msra.mxu1 %v3176_v16  ;;  %1520 = vmatprep.subr.bf16.mxu0 %v3177_v17  ;;  %v3197_v30 = vld [vmem:[#allocation5 + $0x6e4] ss:$16 sps:$4 sm:$0xff]   ;;  %v3199_v31 = vld [vmem:[#allocation5 + $0xe0] ss:$16 sps:$4 sm:$0xff]   ;;  %v3240_v61 = vld [vmem:[#allocation5 + $0xc8] ss:$16 sps:$4 sm:$0xff]  }
  0x6c   :  { %1649 = vmatprep.subr.bf16.mxu1 %v3179_v18  ;;  %v3200_v32 = vld [vmem:[#allocation5 + $0x6e0] ss:$16 sps:$4 sm:$0xff]   ;;  %v3201_v33 = vld [vmem:[#allocation5 + $0x104] ss:$16 sps:$4 sm:$0xff]   ;;  %v3248_v1 = vld [vmem:[#allocation5 + $0xec] ss:$16 sps:$4 sm:$0xff]  }
  0x6d   :  { %v3203_v35 = vld [vmem:[#allocation2 + $0x18] ss:$28 sps:$4 sm:$0xff]   ;;  %v3208_v38 = vld [vmem:[#allocation5 + $0x124] ss:$16 sps:$4 sm:$0xff]   ;;  %v3246_v2 = vld [vmem:[#allocation5 + $0xe8] ss:$16 sps:$4 sm:$0xff]  }
  0x6e   :  { %1521 = vmatpush1.bf16.msra.mxu0 %v3181_v19  ;;  %v3207_v37 = vld [vmem:[#allocation5 + $0x100] ss:$16 sps:$4 sm:$0xff]   ;;  %v3214_v42 = vld [vmem:[#allocation5 + $0x144] ss:$16 sps:$4 sm:$0xff]   ;;  %v3258_v5 = vld [vmem:[#allocation5 + $0x10c] ss:$16 sps:$4 sm:$0xff]  }
  0x6f   :  { %1650 = vmatpush1.bf16.msra.mxu1 %v3182_v20  ;;  %1522 = vmatprep.subr.bf16.mxu0 %v3183_v21  ;;  %v3213_v41 = vld [vmem:[#allocation5 + $0x120] ss:$16 sps:$4 sm:$0xff]   ;;  %v3220_v46 = vld [vmem:[#allocation5 + $0x164] ss:$16 sps:$4 sm:$0xff]   ;;  %v3256_v8 = vld [vmem:[#allocation5 + $0x108] ss:$16 sps:$4 sm:$0xff]  }
  0x70   :  { %1651 = vmatprep.subr.bf16.mxu1 %v3185_v22  ;;  %v3219_v45 = vld [vmem:[#allocation5 + $0x140] ss:$16 sps:$4 sm:$0xff]   ;;  %v3226_v50 = vld [vmem:[#allocation5 + $0x184] ss:$16 sps:$4 sm:$0xff]   ;;  %v3264_v10 = vld [vmem:[#allocation5 + $0x12c] ss:$16 sps:$4 sm:$0xff]  }
  0x71   :  { %v3225_v49 = vld [vmem:[#allocation5 + $0x160] ss:$16 sps:$4 sm:$0xff]   ;;  %v3232_v55 = vld [vmem:[#allocation5 + $0x1a4] ss:$16 sps:$4 sm:$0xff]   ;;  %v3262_v12 = vld [vmem:[#allocation5 + $0x128] ss:$16 sps:$4 sm:$0xff]  }
  0x72   :  { %1523 = vmatpush1.bf16.msra.mxu0 %v3187_v23  ;;  %v3231_v54 = vld [vmem:[#allocation5 + $0x180] ss:$16 sps:$4 sm:$0xff]   ;;  %v3238_v59 = vld [vmem:[#allocation5 + $0x1c4] ss:$16 sps:$4 sm:$0xff]   ;;  %v3270_v14 = vld [vmem:[#allocation5 + $0x14c] ss:$16 sps:$4 sm:$0xff]  }
  0x73   :  { %1652 = vmatpush1.bf16.msra.mxu1 %v3188_v24  ;;  %1524 = vmatprep.subr.bf16.mxu0 %v3189_v25  ;;  %v3237_v58 = vld [vmem:[#allocation5 + $0x1a0] ss:$16 sps:$4 sm:$0xff]   ;;  %v3244_v63 = vld [vmem:[#allocation5 + $0x1e4] ss:$16 sps:$4 sm:$0xff]   ;;  %v3268_v16 = vld [vmem:[#allocation5 + $0x148] ss:$16 sps:$4 sm:$0xff]  }
  0x74   :  { %1653 = vmatprep.subr.bf16.mxu1 %v3191_v26  ;;  %v3243_v62 = vld [vmem:[#allocation5 + $0x1c0] ss:$16 sps:$4 sm:$0xff]   ;;  %v3255_v4 = vld [vmem:[#allocation5 + $0x204] ss:$16 sps:$4 sm:$0xff]   ;;  %v3276_v18 = vld [vmem:[#allocation5 + $0x16c] ss:$16 sps:$4 sm:$0xff]  }
  0x75   :  { %v3249_v3 = vld [vmem:[#allocation5 + $0x1e0] ss:$16 sps:$4 sm:$0xff]   ;;  %v3925_v6 = vld [vmem:[#allocation2] ss:$28 sps:$4 sm:$0xff]   ;;  %v3282_v22 = vld [vmem:[#allocation5 + $0x18c] ss:$16 sps:$4 sm:$0xff]  }
  0x76   :  { %1525 = vmatpush1.bf16.msra.mxu0 %v3193_v27  ;;  %v3253_v7 = vld [vmem:[#allocation5 + $0x200] ss:$16 sps:$4 sm:$0xff]   ;;  %v3261_v9 = vld [vmem:[#allocation5 + $0x224] ss:$16 sps:$4 sm:$0xff]   ;;  %v3274_v20 = vld [vmem:[#allocation5 + $0x168] ss:$16 sps:$4 sm:$0xff]  }
  0x77   :  { %1654 = vmatpush1.bf16.msra.mxu1 %v3194_v28  ;;  %1526 = vmatprep.subr.bf16.mxu0 %v3195_v29  ;;  %v3259_v11 = vld [vmem:[#allocation5 + $0x220] ss:$16 sps:$4 sm:$0xff]   ;;  %v3267_v13 = vld [vmem:[#allocation5 + $0x244] ss:$16 sps:$4 sm:$0xff]   ;;  %v3280_v24 = vld [vmem:[#allocation5 + $0x188] ss:$16 sps:$4 sm:$0xff]  }
  0x78   :  { %1655 = vmatprep.subr.bf16.mxu1 %v3197_v30  ;;  %v3265_v15 = vld [vmem:[#allocation5 + $0x240] ss:$16 sps:$4 sm:$0xff]   ;;  %v3273_v17 = vld [vmem:[#allocation5 + $0x264] ss:$16 sps:$4 sm:$0xff]   ;;  %v3288_v26 = vld [vmem:[#allocation5 + $0x1ac] ss:$16 sps:$4 sm:$0xff]  }
  0x79   :  { %v3271_v19 = vld [vmem:[#allocation5 + $0x260] ss:$16 sps:$4 sm:$0xff]   ;;  %v3279_v21 = vld [vmem:[#allocation5 + $0x284] ss:$16 sps:$4 sm:$0xff]   ;;  %v3286_v28 = vld [vmem:[#allocation5 + $0x1a8] ss:$16 sps:$4 sm:$0xff]  }
  0x7a   :  { %1527 = vmatpush1.bf16.msra.mxu0 %v3199_v31  ;;  %v3277_v23 = vld [vmem:[#allocation5 + $0x280] ss:$16 sps:$4 sm:$0xff]   ;;  %v3285_v25 = vld [vmem:[#allocation5 + $0x2a4] ss:$16 sps:$4 sm:$0xff]   ;;  %v3294_v30 = vld [vmem:[#allocation5 + $0x1cc] ss:$16 sps:$4 sm:$0xff]  }
  0x7b   :  { %1656 = vmatpush1.bf16.msra.mxu1 %v3200_v32  ;;  %1528 = vmatprep.subr.bf16.mxu0 %v3201_v33  ;;  %v3283_v27 = vld [vmem:[#allocation5 + $0x2a0] ss:$16 sps:$4 sm:$0xff]   ;;  %v3291_v29 = vld [vmem:[#allocation5 + $0x2c4] ss:$16 sps:$4 sm:$0xff]   ;;  %v3292_v32 = vld [vmem:[#allocation5 + $0x1c8] ss:$16 sps:$4 sm:$0xff]  }
  0x7c   :  { %1684 = vmatprep.subr.bf16.mxu1 %v3206_v34  ;;  %v3289_v31 = vld [vmem:[#allocation5 + $0x2c0] ss:$16 sps:$4 sm:$0xff]   ;;  %v3297_v33 = vld [vmem:[#allocation5 + $0x2e4] ss:$16 sps:$4 sm:$0xff]   ;;  %s3804_s13 = smov [#allocation11]  }
  0x7d   :  { %v3351_v34 = vld [vmem:[#allocation2 + $0xc] ss:$28 sps:$4 sm:$0xff]   ;;  %s2710_s14 = sshll.u32 %s3804_s13, 4  ;;  %s2711_s14 = int_to_ptr.vmem [resolvable:$true] %s2710_s14 }
  0x7e   :  { %1674 = vmatmul.mubr.bf16.vlgmr.msra.gmra.mrb[0].mxu1 %v3203_v35  ;;  %1529 = vmatpush1.bf16.msra.mxu0 %v3207_v37  ;;  %v3300_v35 = vld [vmem:[#allocation5 + $0x1ec] ss:$16 sps:$4 sm:$0xff]   ;;  %v3298_v37 = vld [vmem:[#allocation5 + $0x1e8] ss:$16 sps:$4 sm:$0xff]   ;;  %s3758_s15 = scalar_lea.vmem %s2711_s14, 256  ;;  %p3763_p13 = scmp.lt.s32.totalorder %s2711_s14, %s2711_s14 }
  0x7f   :  { %1685 = vmatpush1.bf16.msra.mxu1 %v3204_v36  ;;  %1530 = vmatprep.subr.bf16.mxu0 %v3208_v38  ;;  %v3295_v36 = vld [vmem:[#allocation5 + $0x2e0] ss:$16 sps:$4 sm:$0xff]   ;;  %v3303_v38 = vld [vmem:[#allocation5 + $0x304] ss:$16 sps:$4 sm:$0xff]   ;;  %p3759_p12 = scmp.ne.s32.totalorder %s2711_s14, %s3758_s15  ;;  %p3764_p0 = scmp.lt.s32.totalorder %s3758_s15, %s3758_s15 }
  0x80   :  { %1686 = vmatprep.subr.bf16.mxu1 %v3212_v39  ;;  %1716 = vmatprep.mubr.bf16.mxu1 %v3252_v51  ;;  %v3306_v39 = vld [vmem:[#allocation5 + $0x20c] ss:$16 sps:$4 sm:$0xff]  }
  0x81   :  { %v3324_v51 = vld [vmem:[#allocation5 + $0x26c] ss:$16 sps:$4 sm:$0xff]   ;;  %p3765_p1 = por %p3764_p0, %p3763_p13 }
  0x82   :  { %1531 = vmatpush1.bf16.msra.mxu0 %v3213_v41  ;;  %v3304_v41 = vld [vmem:[#allocation5 + $0x208] ss:$16 sps:$4 sm:$0xff]  }
  0x83   :  { %1687 = vmatpush1.bf16.msra.mxu1 %v3210_v40  ;;  %1532 = vmatprep.subr.bf16.mxu0 %v3214_v42  ;;  %v3301_v40 = vld [vmem:[#allocation5 + $0x300] ss:$16 sps:$4 sm:$0xff]   ;;  %v3309_v42 = vld [vmem:[#allocation5 + $0x324] ss:$16 sps:$4 sm:$0xff]   ;;  %p3766_p2 = pnand %p3765_p1, %p3759_p12 }
  0x84   :  { %1688 = vmatprep.subr.bf16.mxu1 %v3218_v43  ;;  %v3312_v43 = vld [vmem:[#allocation5 + $0x22c] ss:$16 sps:$4 sm:$0xff]  }
  0x86   :  { %1533 = vmatpush1.bf16.msra.mxu0 %v3219_v45  ;;  %v3310_v45 = vld [vmem:[#allocation5 + $0x228] ss:$16 sps:$4 sm:$0xff]  }
  0x87   :  { %1689 = vmatpush1.bf16.msra.mxu1 %v3216_v44  ;;  %1534 = vmatprep.subr.bf16.mxu0 %v3220_v46  ;;  %v3307_v44 = vld [vmem:[#allocation5 + $0x320] ss:$16 sps:$4 sm:$0xff]   ;;  %v3315_v46 = vld [vmem:[#allocation5 + $0x344] ss:$16 sps:$4 sm:$0xff]  }
  0x88   :  { %1690 = vmatprep.subr.bf16.mxu1 %v3224_v47  ;;  %v3318_v47 = vld [vmem:[#allocation5 + $0x24c] ss:$16 sps:$4 sm:$0xff]  }
  0x8a   :  { %1535 = vmatpush1.bf16.msra.mxu0 %v3225_v49  ;;  %v3316_v49 = vld [vmem:[#allocation5 + $0x248] ss:$16 sps:$4 sm:$0xff]  }
  0x8b   :  { %1691 = vmatpush1.bf16.msra.mxu1 %v3222_v48  ;;  %1536 = vmatprep.subr.bf16.mxu0 %v3226_v50  ;;  %v3313_v48 = vld [vmem:[#allocation5 + $0x340] ss:$16 sps:$4 sm:$0xff]   ;;  %v3321_v50 = vld [vmem:[#allocation5 + $0x364] ss:$16 sps:$4 sm:$0xff]  }
  0x8c   :  { %1692 = vmatprep.subr.bf16.mxu1 %v3230_v52  ;;  %v3319_v52 = vld [vmem:[#allocation5 + $0x360] ss:$16 sps:$4 sm:$0xff]  }
  0x8e   :  { %1537 = vmatpush1.bf16.msra.mxu0 %v3231_v54  ;;  %v3327_v54 = vld [vmem:[#allocation5 + $0x384] ss:$16 sps:$4 sm:$0xff]  }
  0x8f   :  { %1693 = vmatpush1.bf16.msra.mxu1 %v3228_v53  ;;  %1538 = vmatprep.subr.bf16.mxu0 %v3232_v55  ;;  %v3322_v53 = vld [vmem:[#allocation5 + $0x268] ss:$16 sps:$4 sm:$0xff]   ;;  %v3330_v55 = vld [vmem:[#allocation5 + $0x28c] ss:$16 sps:$4 sm:$0xff]  }
  0x90   :  { %1694 = vmatprep.subr.bf16.mxu1 %v3236_v56  ;;  %v3325_v56 = vld [vmem:[#allocation5 + $0x380] ss:$16 sps:$4 sm:$0xff]  }
  0x92   :  { %1539 = vmatpush1.bf16.msra.mxu0 %v3237_v58  ;;  %v3333_v58 = vld [vmem:[#allocation5 + $0x3a4] ss:$16 sps:$4 sm:$0xff]  }
  0x93   :  { %1695 = vmatpush1.bf16.msra.mxu1 %v3234_v57  ;;  %1540 = vmatprep.subr.bf16.mxu0 %v3238_v59  ;;  %v3328_v57 = vld [vmem:[#allocation5 + $0x288] ss:$16 sps:$4 sm:$0xff]   ;;  %v3336_v59 = vld [vmem:[#allocation5 + $0x2ac] ss:$16 sps:$4 sm:$0xff]  }
  0x94   :  { %1696 = vmatprep.subr.bf16.mxu1 %v3242_v60  ;;  %v3331_v60 = vld [vmem:[#allocation5 + $0x3a0] ss:$16 sps:$4 sm:$0xff]  }
  0x96   :  { %1541 = vmatpush1.bf16.msra.mxu0 %v3243_v62  ;;  %v3339_v62 = vld [vmem:[#allocation5 + $0x3c4] ss:$16 sps:$4 sm:$0xff]  }
  0x97   :  { %1697 = vmatpush1.bf16.msra.mxu1 %v3240_v61  ;;  %1542 = vmatprep.subr.bf16.mxu0 %v3244_v63  ;;  %v3334_v61 = vld [vmem:[#allocation5 + $0x2a8] ss:$16 sps:$4 sm:$0xff]   ;;  %v3342_v63 = vld [vmem:[#allocation5 + $0x2cc] ss:$16 sps:$4 sm:$0xff]  }
  0x98   :  { %1698 = vmatprep.subr.bf16.mxu1 %v3248_v1  ;;  %v3337_v1 = vld [vmem:[#allocation5 + $0x3c0] ss:$16 sps:$4 sm:$0xff]  }
  0x9a   :  { %1543 = vmatpush1.bf16.msra.mxu0 %v3249_v3  ;;  %v3345_v3 = vld [vmem:[#allocation5 + $0x3e4] ss:$16 sps:$4 sm:$0xff]  }
  0x9b   :  { %1699 = vmatpush1.bf16.msra.mxu1 %v3246_v2  ;;  %1555 = vmatprep.subr.bf16.mxu0 %v3255_v4  ;;  %v3340_v2 = vld [vmem:[#allocation5 + $0x2c8] ss:$16 sps:$4 sm:$0xff]   ;;  %v3348_v4 = vld [vmem:[#allocation5 + $0x2ec] ss:$16 sps:$4 sm:$0xff]  }
  0x9c   :  { %1700 = vmatprep.subr.bf16.mxu1 %v3258_v5  ;;  %v3343_v5 = vld [vmem:[#allocation5 + $0x3e0] ss:$16 sps:$4 sm:$0xff]  }
  0x9d   :  { %1545 = vmatmul.mubr.bf16.vlgmr.msra.gmra.mrb[0].mxu0 %v3925_v6 }
  0x9e   :  { %1556 = vmatpush1.bf16.msra.mxu0 %v3253_v7  ;;  %1587 = vmatprep.mubr.bf16.mxu0 %v3351_v34  ;;  %v3354_v7 = vld [vmem:[#allocation5 + $0x404] ss:$16 sps:$4 sm:$0xff]  }
  0x9f   :  { %1701 = vmatpush1.bf16.msra.mxu1 %v3256_v8  ;;  %1557 = vmatprep.subr.bf16.mxu0 %v3261_v9  ;;  %v3357_v8 = vld [vmem:[#allocation5 + $0x30c] ss:$16 sps:$4 sm:$0xff]  }
  0xa0   :  { %1702 = vmatprep.subr.bf16.mxu1 %v3264_v10  ;;  %v3929_v9 = vld [vmem:[#allocation2 + $0x8] ss:$28 sps:$4 sm:$0xff]  }
  0xa1   :  { %v3352_v10 = vld [vmem:[#allocation5 + $0x400] ss:$16 sps:$4 sm:$0xff]  }
  0xa2   :  { %1558 = vmatpush1.bf16.msra.mxu0 %v3259_v11  ;;  %v3355_v11 = vld [vmem:[#allocation5 + $0x308] ss:$16 sps:$4 sm:$0xff]  }
  0xa3   :  { %1703 = vmatpush1.bf16.msra.mxu1 %v3262_v12  ;;  %1559 = vmatprep.subr.bf16.mxu0 %v3267_v13  ;;  %v3360_v12 = vld [vmem:[#allocation5 + $0x424] ss:$16 sps:$4 sm:$0xff]   ;;  %v3363_v13 = vld [vmem:[#allocation5 + $0x32c] ss:$16 sps:$4 sm:$0xff]  }
  0xa4   :  { %1704 = vmatprep.subr.bf16.mxu1 %v3270_v14  ;;  %v3358_v14 = vld [vmem:[#allocation5 + $0x420] ss:$16 sps:$4 sm:$0xff]  }
  0xa6   :  { %1560 = vmatpush1.bf16.msra.mxu0 %v3265_v15  ;;  %v3361_v15 = vld [vmem:[#allocation5 + $0x328] ss:$16 sps:$4 sm:$0xff]  }
  0xa7   :  { %1705 = vmatpush1.bf16.msra.mxu1 %v3268_v16  ;;  %1561 = vmatprep.subr.bf16.mxu0 %v3273_v17  ;;  %v3366_v16 = vld [vmem:[#allocation5 + $0x444] ss:$16 sps:$4 sm:$0xff]   ;;  %v3932_v17 = vld [vmem:[#allocation2 + $0x14] ss:$28 sps:$4 sm:$0xff]  }
  0xa8   :  { %1706 = vmatprep.subr.bf16.mxu1 %v3276_v18  ;;  %v3369_v18 = vld [vmem:[#allocation5 + $0x34c] ss:$16 sps:$4 sm:$0xff]  }
  0xaa   :  { %1562 = vmatpush1.bf16.msra.mxu0 %v3271_v19  ;;  %v3364_v19 = vld [vmem:[#allocation5 + $0x440] ss:$16 sps:$4 sm:$0xff]  }
  0xab   :  { %1707 = vmatpush1.bf16.msra.mxu1 %v3274_v20  ;;  %1563 = vmatprep.subr.bf16.mxu0 %v3279_v21  ;;  %v3367_v20 = vld [vmem:[#allocation5 + $0x348] ss:$16 sps:$4 sm:$0xff]   ;;  %v3372_v21 = vld [vmem:[#allocation5 + $0x464] ss:$16 sps:$4 sm:$0xff]  }
  0xac   :  { %1708 = vmatprep.subr.bf16.mxu1 %v3282_v22  ;;  %v3375_v22 = vld [vmem:[#allocation5 + $0x36c] ss:$16 sps:$4 sm:$0xff]  }
  0xae   :  { %1564 = vmatpush1.bf16.msra.mxu0 %v3277_v23  ;;  %v3370_v23 = vld [vmem:[#allocation5 + $0x460] ss:$16 sps:$4 sm:$0xff]  }
  0xaf   :  { %1709 = vmatpush1.bf16.msra.mxu1 %v3280_v24  ;;  %1565 = vmatprep.subr.bf16.mxu0 %v3285_v25  ;;  %v3373_v24 = vld [vmem:[#allocation5 + $0x368] ss:$16 sps:$4 sm:$0xff]   ;;  %v3378_v25 = vld [vmem:[#allocation5 + $0x484] ss:$16 sps:$4 sm:$0xff]  }
  0xb0   :  { %1710 = vmatprep.subr.bf16.mxu1 %v3288_v26  ;;  %v3381_v26 = vld [vmem:[#allocation5 + $0x38c] ss:$16 sps:$4 sm:$0xff]  }
  0xb2   :  { %1566 = vmatpush1.bf16.msra.mxu0 %v3283_v27  ;;  %v3376_v27 = vld [vmem:[#allocation5 + $0x480] ss:$16 sps:$4 sm:$0xff]  }
  0xb3   :  { %1711 = vmatpush1.bf16.msra.mxu1 %v3286_v28  ;;  %1567 = vmatprep.subr.bf16.mxu0 %v3291_v29  ;;  %v3379_v28 = vld [vmem:[#allocation5 + $0x388] ss:$16 sps:$4 sm:$0xff]   ;;  %v3384_v29 = vld [vmem:[#allocation5 + $0x4a4] ss:$16 sps:$4 sm:$0xff]  }
  0xb4   :  { %1712 = vmatprep.subr.bf16.mxu1 %v3294_v30  ;;  %v3387_v30 = vld [vmem:[#allocation5 + $0x3ac] ss:$16 sps:$4 sm:$0xff]  }
  0xb6   :  { %1568 = vmatpush1.bf16.msra.mxu0 %v3289_v31  ;;  %v3382_v31 = vld [vmem:[#allocation5 + $0x4a0] ss:$16 sps:$4 sm:$0xff]  }
  0xb7   :  { %1713 = vmatpush1.bf16.msra.mxu1 %v3292_v32  ;;  %1569 = vmatprep.subr.bf16.mxu0 %v3297_v33  ;;  %v3385_v32 = vld [vmem:[#allocation5 + $0x3a8] ss:$16 sps:$4 sm:$0xff]   ;;  %v3390_v33 = vld [vmem:[#allocation5 + $0x4c4] ss:$16 sps:$4 sm:$0xff]  }
  0xb8   :  { %1714 = vmatprep.subr.bf16.mxu1 %v3300_v35  ;;  %v3388_v35 = vld [vmem:[#allocation5 + $0x4c0] ss:$16 sps:$4 sm:$0xff]  }
  0xba   :  { %1570 = vmatpush1.bf16.msra.mxu0 %v3295_v36  ;;  %v3391_v36 = vld [vmem:[#allocation5 + $0x3c8] ss:$16 sps:$4 sm:$0xff]  }
  0xbb   :  { %1715 = vmatpush1.bf16.msra.mxu1 %v3298_v37  ;;  %1571 = vmatprep.subr.bf16.mxu0 %v3303_v38  ;;  %v3396_v37 = vld [vmem:[#allocation5 + $0x4e4] ss:$16 sps:$4 sm:$0xff]   ;;  %v3399_v38 = vld [vmem:[#allocation5 + $0x3ec] ss:$16 sps:$4 sm:$0xff]  }
  0xbc   :  { %1727 = vmatprep.subr.bf16.mxu1 %v3306_v39  ;;  %v3394_v39 = vld [vmem:[#allocation5 + $0x4e0] ss:$16 sps:$4 sm:$0xff]  }
  0xbe   :  { %1717 = vmatmul.mubr.bf16.vlgmr.msra.gmra.mrb[4].mxu1 %v3925_v6  ;;  %1572 = vmatpush1.bf16.msra.mxu0 %v3301_v40  ;;  %v3346_v6 = vld [vmem:[#allocation5 + $0x2e8] ss:$16 sps:$4 sm:$0xff]  }
  0xbf   :  { %1728 = vmatpush1.bf16.msra.mxu1 %v3304_v41  ;;  %1573 = vmatprep.subr.bf16.mxu0 %v3309_v42  ;;  %v3397_v40 = vld [vmem:[#allocation5 + $0x3e8] ss:$16 sps:$4 sm:$0xff]   ;;  %v3402_v41 = vld [vmem:[#allocation5 + $0x504] ss:$16 sps:$4 sm:$0xff]   ;;  %v3405_v42 = vld [vmem:[#allocation5 + $0x40c] ss:$16 sps:$4 sm:$0xff]  }
  0xc0   :  { %1729 = vmatprep.subr.bf16.mxu1 %v3312_v43  ;;  %1759 = vmatprep.mubr.bf16.mxu1 %v3351_v34  ;;  %v3393_v34 = vld [vmem:[#allocation5 + $0x3cc] ss:$16 sps:$4 sm:$0xff]   ;;  %v3400_v43 = vld [vmem:[#allocation5 + $0x500] ss:$16 sps:$4 sm:$0xff]  }
  0xc2   :  { %1574 = vmatpush1.bf16.msra.mxu0 %v3307_v44  ;;  %v3403_v44 = vld [vmem:[#allocation5 + $0x408] ss:$16 sps:$4 sm:$0xff]  }
  0xc3   :  { %1730 = vmatpush1.bf16.msra.mxu1 %v3310_v45  ;;  %1575 = vmatprep.subr.bf16.mxu0 %v3315_v46  ;;  %v3408_v45 = vld [vmem:[#allocation5 + $0x524] ss:$16 sps:$4 sm:$0xff]   ;;  %v3411_v46 = vld [vmem:[#allocation5 + $0x42c] ss:$16 sps:$4 sm:$0xff]  }
  0xc4   :  { %1731 = vmatprep.subr.bf16.mxu1 %v3318_v47  ;;  %v3406_v47 = vld [vmem:[#allocation5 + $0x520] ss:$16 sps:$4 sm:$0xff]  }
  0xc6   :  { %1576 = vmatpush1.bf16.msra.mxu0 %v3313_v48  ;;  %v3409_v48 = vld [vmem:[#allocation5 + $0x428] ss:$16 sps:$4 sm:$0xff]  }
  0xc7   :  { %1732 = vmatpush1.bf16.msra.mxu1 %v3316_v49  ;;  %1577 = vmatprep.subr.bf16.mxu0 %v3321_v50  ;;  %v3414_v49 = vld [vmem:[#allocation5 + $0x544] ss:$16 sps:$4 sm:$0xff]   ;;  %v3417_v50 = vld [vmem:[#allocation5 + $0x44c] ss:$16 sps:$4 sm:$0xff]  }
  0xc8   :  { %1733 = vmatprep.subr.bf16.mxu1 %v3324_v51  ;;  %v3412_v51 = vld [vmem:[#allocation5 + $0x540] ss:$16 sps:$4 sm:$0xff]  }
  0xca   :  { %1578 = vmatpush1.bf16.msra.mxu0 %v3319_v52  ;;  %v3415_v52 = vld [vmem:[#allocation5 + $0x448] ss:$16 sps:$4 sm:$0xff]  }
  0xcb   :  { %1734 = vmatpush1.bf16.msra.mxu1 %v3322_v53  ;;  %1579 = vmatprep.subr.bf16.mxu0 %v3327_v54  ;;  %v3420_v53 = vld [vmem:[#allocation5 + $0x564] ss:$16 sps:$4 sm:$0xff]   ;;  %v3423_v54 = vld [vmem:[#allocation5 + $0x46c] ss:$16 sps:$4 sm:$0xff]  }
  0xcc   :  { %1735 = vmatprep.subr.bf16.mxu1 %v3330_v55  ;;  %v3418_v55 = vld [vmem:[#allocation5 + $0x560] ss:$16 sps:$4 sm:$0xff]  }
  0xce   :  { %1580 = vmatpush1.bf16.msra.mxu0 %v3325_v56  ;;  %v3421_v56 = vld [vmem:[#allocation5 + $0x468] ss:$16 sps:$4 sm:$0xff]  }
  0xcf   :  { %1736 = vmatpush1.bf16.msra.mxu1 %v3328_v57  ;;  %1581 = vmatprep.subr.bf16.mxu0 %v3333_v58  ;;  %v3426_v57 = vld [vmem:[#allocation5 + $0x584] ss:$16 sps:$4 sm:$0xff]   ;;  %v3429_v58 = vld [vmem:[#allocation5 + $0x48c] ss:$16 sps:$4 sm:$0xff]  }
  0xd0   :  { %1737 = vmatprep.subr.bf16.mxu1 %v3336_v59  ;;  %v3424_v59 = vld [vmem:[#allocation5 + $0x580] ss:$16 sps:$4 sm:$0xff]  }
  0xd2   :  { %1582 = vmatpush1.bf16.msra.mxu0 %v3331_v60  ;;  %v3427_v60 = vld [vmem:[#allocation5 + $0x488] ss:$16 sps:$4 sm:$0xff]  }
  0xd3   :  { %1738 = vmatpush1.bf16.msra.mxu1 %v3334_v61  ;;  %1583 = vmatprep.subr.bf16.mxu0 %v3339_v62  ;;  %v3432_v61 = vld [vmem:[#allocation5 + $0x5a4] ss:$16 sps:$4 sm:$0xff]   ;;  %v3435_v62 = vld [vmem:[#allocation5 + $0x4ac] ss:$16 sps:$4 sm:$0xff]  }
  0xd4   :  { %1739 = vmatprep.subr.bf16.mxu1 %v3342_v63  ;;  %v3430_v63 = vld [vmem:[#allocation5 + $0x5a0] ss:$16 sps:$4 sm:$0xff]  }
  0xd6   :  { %1584 = vmatpush1.bf16.msra.mxu0 %v3337_v1  ;;  %v3433_v1 = vld [vmem:[#allocation5 + $0x4a8] ss:$16 sps:$4 sm:$0xff]  }
  0xd7   :  { %1740 = vmatpush1.bf16.msra.mxu1 %v3340_v2  ;;  %1585 = vmatprep.subr.bf16.mxu0 %v3345_v3  ;;  %v3438_v2 = vld [vmem:[#allocation5 + $0x5c4] ss:$16 sps:$4 sm:$0xff]   ;;  %v3441_v3 = vld [vmem:[#allocation5 + $0x4cc] ss:$16 sps:$4 sm:$0xff]  }
  0xd8   :  { %1741 = vmatprep.subr.bf16.mxu1 %v3348_v4  ;;  %v3436_v4 = vld [vmem:[#allocation5 + $0x5c0] ss:$16 sps:$4 sm:$0xff]  }
  0xda   :  { %1586 = vmatpush1.bf16.msra.mxu0 %v3343_v5  ;;  %v3439_v5 = vld [vmem:[#allocation5 + $0x4c8] ss:$16 sps:$4 sm:$0xff]  }
  0xdb   :  { %1742 = vmatpush1.bf16.msra.mxu1 %v3346_v6  ;;  %1598 = vmatprep.subr.bf16.mxu0 %v3354_v7  ;;  %v3444_v6 = vld [vmem:[#allocation5 + $0x5e4] ss:$16 sps:$4 sm:$0xff]   ;;  %v3447_v7 = vld [vmem:[#allocation5 + $0x4ec] ss:$16 sps:$4 sm:$0xff]  }
  0xdc   :  { %1743 = vmatprep.subr.bf16.mxu1 %v3357_v8  ;;  %v3442_v8 = vld [vmem:[#allocation5 + $0x5e0] ss:$16 sps:$4 sm:$0xff]  }
  0xdd   :  { %1588 = vmatmul.mubr.bf16.vlgmr.msra.gmra.mrb[0].mxu0 %v3929_v9 }
  0xde   :  { %1599 = vmatpush1.bf16.msra.mxu0 %v3352_v10  ;;  %1630 = vmatprep.mubr.bf16.mxu0 %v3932_v17  ;;  %v3453_v10 = vld [vmem:[#allocation5 + $0x50c] ss:$16 sps:$4 sm:$0xff]  }
  0xdf   :  { %1744 = vmatpush1.bf16.msra.mxu1 %v3355_v11  ;;  %1600 = vmatprep.subr.bf16.mxu0 %v3360_v12  ;;  %v3501_v11 = vld [vmem:[#allocation7 + $0x4] ss:$8 sps:$4 sm:$0xff]   ;;  %v3937_v12 = vld [vmem:[#allocation2 + $0x10] ss:$28 sps:$4 sm:$0xff]  }
  0xe0   :  { %1745 = vmatprep.subr.bf16.mxu1 %v3363_v13  ;;  %v3451_v13 = vld [vmem:[#allocation5 + $0x508] ss:$16 sps:$4 sm:$0xff]  }
  0xe2   :  { %1601 = vmatpush1.bf16.msra.mxu0 %v3358_v14  ;;  %v3499_v14 = vld [vmem:[#allocation7] ss:$8 sps:$4 sm:$0xff]  }
  0xe3   :  { %1746 = vmatpush1.bf16.msra.mxu1 %v3361_v15  ;;  %1602 = vmatprep.subr.bf16.mxu0 %v3366_v16  ;;  %v3456_v15 = vld [vmem:[#allocation5 + $0x52c] ss:$16 sps:$4 sm:$0xff]  }
  0xe4   :  { %1747 = vmatprep.subr.bf16.mxu1 %v3369_v18  ;;  %v3504_v16 = vld [vmem:[#allocation7 + $0x14] ss:$8 sps:$4 sm:$0xff]   ;;  %v3502_v18 = vld [vmem:[#allocation7 + $0x10] ss:$8 sps:$4 sm:$0xff]  }
  0xe6   :  { %1603 = vmatpush1.bf16.msra.mxu0 %v3364_v19  ;;  %v3459_v19 = vld [vmem:[#allocation5 + $0x54c] ss:$16 sps:$4 sm:$0xff]  }
  0xe7   :  { %1748 = vmatpush1.bf16.msra.mxu1 %v3367_v20  ;;  %1604 = vmatprep.subr.bf16.mxu0 %v3372_v21  ;;  %v3507_v20 = vld [vmem:[#allocation7 + $0x24] ss:$8 sps:$4 sm:$0xff]   ;;  %v3457_v21 = vld [vmem:[#allocation5 + $0x548] ss:$16 sps:$4 sm:$0xff]  }
  0xe8   :  { %1749 = vmatprep.subr.bf16.mxu1 %v3375_v22  ;;  %v3505_v22 = vld [vmem:[#allocation7 + $0x20] ss:$8 sps:$4 sm:$0xff]  }
  0xea   :  { %1605 = vmatpush1.bf16.msra.mxu0 %v3370_v23  ;;  %v3462_v23 = vld [vmem:[#allocation5 + $0x56c] ss:$16 sps:$4 sm:$0xff]  }
  0xeb   :  { %1750 = vmatpush1.bf16.msra.mxu1 %v3373_v24  ;;  %1606 = vmatprep.subr.bf16.mxu0 %v3378_v25  ;;  %v3510_v24 = vld [vmem:[#allocation7 + $0x34] ss:$8 sps:$4 sm:$0xff]   ;;  %v3460_v25 = vld [vmem:[#allocation5 + $0x568] ss:$16 sps:$4 sm:$0xff]  }
  0xec   :  { %1751 = vmatprep.subr.bf16.mxu1 %v3381_v26  ;;  %v3508_v26 = vld [vmem:[#allocation7 + $0x30] ss:$8 sps:$4 sm:$0xff]  }
  0xee   :  { %1607 = vmatpush1.bf16.msra.mxu0 %v3376_v27  ;;  %v3465_v27 = vld [vmem:[#allocation5 + $0x58c] ss:$16 sps:$4 sm:$0xff]  }
  0xef   :  { %1752 = vmatpush1.bf16.msra.mxu1 %v3379_v28  ;;  %1608 = vmatprep.subr.bf16.mxu0 %v3384_v29  ;;  %v3513_v28 = vld [vmem:[#allocation7 + $0x44] ss:$8 sps:$4 sm:$0xff]   ;;  %v3463_v29 = vld [vmem:[#allocation5 + $0x588] ss:$16 sps:$4 sm:$0xff]  }
  0xf0   :  { %1753 = vmatprep.subr.bf16.mxu1 %v3387_v30  ;;  %v3511_v30 = vld [vmem:[#allocation7 + $0x40] ss:$8 sps:$4 sm:$0xff]  }
  0xf2   :  { %1609 = vmatpush1.bf16.msra.mxu0 %v3382_v31  ;;  %v3468_v31 = vld [vmem:[#allocation5 + $0x5ac] ss:$16 sps:$4 sm:$0xff]  }
  0xf3   :  { %1754 = vmatpush1.bf16.msra.mxu1 %v3385_v32  ;;  %1610 = vmatprep.subr.bf16.mxu0 %v3390_v33  ;;  %v3516_v32 = vld [vmem:[#allocation7 + $0x54] ss:$8 sps:$4 sm:$0xff]   ;;  %v3466_v33 = vld [vmem:[#allocation5 + $0x5a8] ss:$16 sps:$4 sm:$0xff]  }
  0xf4   :  { %1755 = vmatprep.subr.bf16.mxu1 %v3393_v34  ;;  %v3514_v34 = vld [vmem:[#allocation7 + $0x50] ss:$8 sps:$4 sm:$0xff]  }
  0xf6   :  { %1611 = vmatpush1.bf16.msra.mxu0 %v3388_v35  ;;  %v3471_v35 = vld [vmem:[#allocation5 + $0x5cc] ss:$16 sps:$4 sm:$0xff]  }
  0xf7   :  { %1756 = vmatpush1.bf16.msra.mxu1 %v3391_v36  ;;  %1612 = vmatprep.subr.bf16.mxu0 %v3396_v37  ;;  %v3519_v36 = vld [vmem:[#allocation7 + $0x64] ss:$8 sps:$4 sm:$0xff]   ;;  %v3469_v37 = vld [vmem:[#allocation5 + $0x5c8] ss:$16 sps:$4 sm:$0xff]  }
  0xf8   :  { %1757 = vmatprep.subr.bf16.mxu1 %v3399_v38  ;;  %v3517_v38 = vld [vmem:[#allocation7 + $0x60] ss:$8 sps:$4 sm:$0xff]  }
  0xfa   :  { %1613 = vmatpush1.bf16.msra.mxu0 %v3394_v39  ;;  %v3474_v39 = vld [vmem:[#allocation5 + $0x5ec] ss:$16 sps:$4 sm:$0xff]  }
  0xfb   :  { %1758 = vmatpush1.bf16.msra.mxu1 %v3397_v40  ;;  %1614 = vmatprep.subr.bf16.mxu0 %v3402_v41  ;;  %v3522_v40 = vld [vmem:[#allocation7 + $0x74] ss:$8 sps:$4 sm:$0xff]   ;;  %v3472_v41 = vld [vmem:[#allocation5 + $0x5e8] ss:$16 sps:$4 sm:$0xff]  }
  0xfc   :  { %1770 = vmatprep.subr.bf16.mxu1 %v3405_v42  ;;  %v3520_v42 = vld [vmem:[#allocation7 + $0x70] ss:$8 sps:$4 sm:$0xff]  }
  0xfe   :  { %1760 = vmatmul.mubr.bf16.vlgmr.msra.gmra.mrb[4].mxu1 %v3929_v9  ;;  %1615 = vmatpush1.bf16.msra.mxu0 %v3400_v43  ;;  %v3445_v9 = vld [vmem:[#allocation5 + $0x4e8] ss:$16 sps:$4 sm:$0xff]   ;;  %v3477_v43 = vld [vmem:[#allocation5 + $0x60c] ss:$16 sps:$4 sm:$0xff]  }
  0xff   :  { %1771 = vmatpush1.bf16.msra.mxu1 %v3403_v44  ;;  %1616 = vmatprep.subr.bf16.mxu0 %v3408_v45  ;;  %v3525_v44 = vld [vmem:[#allocation7 + $0x84] ss:$8 sps:$4 sm:$0xff]   ;;  %v3475_v45 = vld [vmem:[#allocation5 + $0x608] ss:$16 sps:$4 sm:$0xff]  }
 0x100   :  { %1772 = vmatprep.subr.bf16.mxu1 %v3411_v46  ;;  %1802 = vmatprep.mubr.bf16.mxu1 %v3932_v17  ;;  %v3454_v17 = vld [vmem:[#allocation5 + $0x528] ss:$16 sps:$4 sm:$0xff]   ;;  %v3480_v46 = vld [vmem:[#allocation5 + $0x62c] ss:$16 sps:$4 sm:$0xff]  }
 0x102   :  { %1617 = vmatpush1.bf16.msra.mxu0 %v3406_v47  ;;  %v3523_v47 = vld [vmem:[#allocation7 + $0x80] ss:$8 sps:$4 sm:$0xff]  }
 0x103   :  { %1773 = vmatpush1.bf16.msra.mxu1 %v3409_v48  ;;  %1618 = vmatprep.subr.bf16.mxu0 %v3414_v49  ;;  %v3528_v48 = vld [vmem:[#allocation7 + $0x94] ss:$8 sps:$4 sm:$0xff]   ;;  %v3478_v49 = vld [vmem:[#allocation5 + $0x628] ss:$16 sps:$4 sm:$0xff]  }
 0x104   :  { %1774 = vmatprep.subr.bf16.mxu1 %v3417_v50  ;;  %v3483_v50 = vld [vmem:[#allocation5 + $0x64c] ss:$16 sps:$4 sm:$0xff]  }
 0x106   :  { %1619 = vmatpush1.bf16.msra.mxu0 %v3412_v51  ;;  %v3526_v51 = vld [vmem:[#allocation7 + $0x90] ss:$8 sps:$4 sm:$0xff]  }
 0x107   :  { %1775 = vmatpush1.bf16.msra.mxu1 %v3415_v52  ;;  %1620 = vmatprep.subr.bf16.mxu0 %v3420_v53  ;;  %v3481_v52 = vld [vmem:[#allocation5 + $0x648] ss:$16 sps:$4 sm:$0xff]   ;;  %v3486_v53 = vld [vmem:[#allocation5 + $0x66c] ss:$16 sps:$4 sm:$0xff]  }
 0x108   :  { %1776 = vmatprep.subr.bf16.mxu1 %v3423_v54  ;;  %v3484_v54 = vld [vmem:[#allocation5 + $0x668] ss:$16 sps:$4 sm:$0xff]  }
 0x10a   :  { %1621 = vmatpush1.bf16.msra.mxu0 %v3418_v55  ;;  %v3489_v55 = vld [vmem:[#allocation5 + $0x68c] ss:$16 sps:$4 sm:$0xff]  }
 0x10b   :  { %1777 = vmatpush1.bf16.msra.mxu1 %v3421_v56  ;;  %1622 = vmatprep.subr.bf16.mxu0 %v3426_v57  ;;  %v3487_v56 = vld [vmem:[#allocation5 + $0x688] ss:$16 sps:$4 sm:$0xff]   ;;  %v3492_v57 = vld [vmem:[#allocation5 + $0x6ac] ss:$16 sps:$4 sm:$0xff]  }
 0x10c   :  { %1778 = vmatprep.subr.bf16.mxu1 %v3429_v58  ;;  %v3495_v58 = vld [vmem:[#allocation5 + $0x6cc] ss:$16 sps:$4 sm:$0xff]  }
 0x10e   :  { %1623 = vmatpush1.bf16.msra.mxu0 %v3424_v59 }
 0x10f   :  { %1779 = vmatpush1.bf16.msra.mxu1 %v3427_v60  ;;  %1624 = vmatprep.subr.bf16.mxu0 %v3432_v61 }
 0x110   :  { %1780 = vmatprep.subr.bf16.mxu1 %v3435_v62  ;;  %v3493_v62 = vld [vmem:[#allocation5 + $0x6c8] ss:$16 sps:$4 sm:$0xff]  }
 0x112   :  { %1625 = vmatpush1.bf16.msra.mxu0 %v3430_v63 }
 0x113   :  { %1781 = vmatpush1.bf16.msra.mxu1 %v3433_v1  ;;  %1626 = vmatprep.subr.bf16.mxu0 %v3438_v2  ;;  %v3498_v1 = vld [vmem:[#allocation5 + $0x6ec] ss:$16 sps:$4 sm:$0xff]   ;;  %v3496_v2 = vld [vmem:[#allocation5 + $0x6e8] ss:$16 sps:$4 sm:$0xff]  }
 0x114   :  { %1782 = vmatprep.subr.bf16.mxu1 %v3441_v3  ;;  %v3647_v3 = vld [vmem:[#allocation2 + $0x18] ss:$28 sps:$4 sm:$0xff]  }
 0x116   :  { %1627 = vmatpush1.bf16.msra.mxu0 %v3436_v4  ;;  %v3531_v4 = vld [vmem:[#allocation7 + $0xa4] ss:$8 sps:$4 sm:$0xff]  }
 0x117   :  { %1783 = vmatpush1.bf16.msra.mxu1 %v3439_v5  ;;  %1628 = vmatprep.subr.bf16.mxu0 %v3444_v6  ;;  %v3529_v5 = vld [vmem:[#allocation7 + $0xa0] ss:$8 sps:$4 sm:$0xff]   ;;  %v3534_v6 = vld [vmem:[#allocation7 + $0xb4] ss:$8 sps:$4 sm:$0xff]  }
 0x118   :  { %1784 = vmatprep.subr.bf16.mxu1 %v3447_v7  ;;  %v3532_v7 = vld [vmem:[#allocation7 + $0xb0] ss:$8 sps:$4 sm:$0xff]  }
 0x11a   :  { %1629 = vmatpush1.bf16.msra.mxu0 %v3442_v8  ;;  %v3537_v8 = vld [vmem:[#allocation7 + $0xc4] ss:$8 sps:$4 sm:$0xff]  }
 0x11b   :  { %1785 = vmatpush1.bf16.msra.mxu1 %v3445_v9  ;;  %2296 = vmatprep.subr.bf16.mxu0 %v3501_v11  ;;  %v3535_v9 = vld [vmem:[#allocation7 + $0xc0] ss:$8 sps:$4 sm:$0xff]   ;;  %v3538_v11 = vld [vmem:[#allocation7 + $0xd0] ss:$8 sps:$4 sm:$0xff]  }
 0x11c   :  { %1786 = vmatprep.subr.bf16.mxu1 %v3453_v10  ;;  %v3540_v10 = vld [vmem:[#allocation7 + $0xd4] ss:$8 sps:$4 sm:$0xff]  }
 0x11d   :  { %1631 = vmatmul.mubr.bf16.vlgmr.msra.gmra.mrb[0].mxu0 %v3937_v12 }
 0x11e   :  { %2297 = vmatpush1.bf16.msra.mxu0 %v3499_v14  ;;  %v3546_v14 = vld [vmem:[#allocation7 + $0xf4] ss:$8 sps:$4 sm:$0xff]  }
 0x11f   :  { %1787 = vmatpush1.bf16.msra.mxu1 %v3451_v13  ;;  %2298 = vmatprep.subr.bf16.mxu0 %v3504_v16  ;;  %v3541_v13 = vld [vmem:[#allocation7 + $0xe0] ss:$8 sps:$4 sm:$0xff]   ;;  %v3549_v16 = vld [vmem:[#allocation7 + $0x104] ss:$8 sps:$4 sm:$0xff]  }
 0x120   :  { %1788 = vmatprep.subr.bf16.mxu1 %v3456_v15  ;;  %v3544_v15 = vld [vmem:[#allocation7 + $0xf0] ss:$8 sps:$4 sm:$0xff]  }
 0x122   :  { %2299 = vmatpush1.bf16.msra.mxu0 %v3502_v18  ;;  %v3596_v18 = vld [vmem:[#allocation8] sm:$0xff]  }
 0x123   :  { %1789 = vmatpush1.bf16.msra.mxu1 %v3454_v17  ;;  %2300 = vmatprep.subr.bf16.mxu0 %v3507_v20  ;;  %v3595_v17 = vld [vmem:[#allocation8 + $0x40] sm:$0xff]   ;;  %v3598_v20 = vld [vmem:[#allocation8 + $0x8] sm:$0xff]  }
 0x124   :  { %1790 = vmatprep.subr.bf16.mxu1 %v3459_v19  ;;  %v3597_v19 = vld [vmem:[#allocation8 + $0x48] sm:$0xff]  }
 0x126   :  { %2301 = vmatpush1.bf16.msra.mxu0 %v3505_v22 }
 0x127   :  { %1791 = vmatpush1.bf16.msra.mxu1 %v3457_v21  ;;  %2302 = vmatprep.subr.bf16.mxu0 %v3510_v24  ;;  %v336_v21 = vlaneseq  ;;  %v3952_v24 = vld [vmem:[%s4006_s2] sm:$0xf] }
 0x128   :  { %1792 = vmatprep.subr.bf16.mxu1 %v3462_v23 }
 0x129   :  { %v3946_v22 = vshrl.u32 %v336_v21, 7  ;;  %v3579_v21 = vld [vmem:[#allocation7 + $0x1a4] ss:$8 sps:$4 sm:$0xff]  }
 0x12a   :  { %2303 = vmatpush1.bf16.msra.mxu0 %v3508_v26 }
 0x12b   :  { %1793 = vmatpush1.bf16.msra.mxu1 %v3460_v25  ;;  %2304 = vmatprep.subr.bf16.mxu0 %v3513_v28  ;;  %v338_v23 = vsub.s32 0, %v3946_v22  ;;  %v342_v25 = vsub.s32 1, %v3946_v22 }
 0x12c   :  { %1794 = vmatprep.subr.bf16.mxu1 %v3465_v27 }
 0x12d   :  { %v339_v26 = vrot.slane %v3952_v24, %v338_v23  ;;  %v343_v27 = vrot.slane %v3952_v24, %v342_v25 }
 0x12e   :  { %2305 = vmatpush1.bf16.msra.mxu0 %v3511_v30 }
 0x12f   :  { %1795 = vmatpush1.bf16.msra.mxu1 %v3463_v29  ;;  %2306 = vmatprep.subr.bf16.mxu0 %v3516_v32 }
 0x130   :  { %1796 = vmatprep.subr.bf16.mxu1 %v3468_v31 }
 0x132   :  { %2307 = vmatpush1.bf16.msra.mxu0 %v3514_v34 }
 0x133   :  { %1797 = vmatpush1.bf16.msra.mxu1 %v3466_v33  ;;  %2308 = vmatprep.subr.bf16.mxu0 %v3519_v36 }
 0x134   :  { %1798 = vmatprep.subr.bf16.mxu1 %v3471_v35 }
 0x136   :  { %2309 = vmatpush1.bf16.msra.mxu0 %v3517_v38 }
 0x137   :  { %1799 = vmatpush1.bf16.msra.mxu1 %v3469_v37  ;;  %2310 = vmatprep.subr.bf16.mxu0 %v3522_v40 }
 0x138   :  { %1800 = vmatprep.subr.bf16.mxu1 %v3474_v39 }
 0x13a   :  { %2311 = vmatpush1.bf16.msra.mxu0 %v3520_v42 }
 0x13b   :  { %1801 = vmatpush1.bf16.msra.mxu1 %v3472_v41  ;;  %2312 = vmatprep.subr.bf16.mxu0 %v3525_v44 }
 0x13c   :  { %1813 = vmatprep.subr.bf16.mxu1 %v3477_v43 }
 0x13e   :  { %1803 = vmatmul.mubr.bf16.vlgmr.msra.gmra.mrb[4].mxu1 %v3937_v12  ;;  %2313 = vmatpush1.bf16.msra.mxu0 %v3523_v47  ;;  %v3543_v12 = vld [vmem:[#allocation7 + $0xe4] ss:$8 sps:$4 sm:$0xff]  }
 0x13f   :  { %1814 = vmatpush1.bf16.msra.mxu1 %v3475_v45  ;;  %1845 = vmatprep.mubr.bf16.mxu1 %v3801_v0  ;;  %v3490_v0 = vld [vmem:[#allocation5 + $0x6a8] ss:$16 sps:$4 sm:$0xff]  }
 0x140   :  { %1815 = vmatprep.subr.bf16.mxu1 %v3480_v46  ;;  %2314 = vmatprep.subr.bf16.mxu0 %v3528_v48 }
 0x142   :  { %2315 = vmatpush1.bf16.msra.mxu0 %v3526_v51 }
 0x143   :  { %1816 = vmatpush1.bf16.msra.mxu1 %v3478_v49  ;;  %2316 = vmatprep.subr.bf16.mxu0 %v3531_v4  ;;  %v3556_v4 = vld [vmem:[#allocation7 + $0x130] ss:$8 sps:$4 sm:$0xff]  }
 0x144   :  { %1817 = vmatprep.subr.bf16.mxu1 %v3483_v50 }
 0x146   :  { %2317 = vmatpush1.bf16.msra.mxu0 %v3529_v5  ;;  %v3561_v5 = vld [vmem:[#allocation7 + $0x144] ss:$8 sps:$4 sm:$0xff]  }
 0x147   :  { %1818 = vmatpush1.bf16.msra.mxu1 %v3481_v52  ;;  %2318 = vmatprep.subr.bf16.mxu0 %v3534_v6  ;;  %v3559_v6 = vld [vmem:[#allocation7 + $0x140] ss:$8 sps:$4 sm:$0xff]  }
 0x148   :  { %1819 = vmatprep.subr.bf16.mxu1 %v3486_v53 }
 0x14a   :  { %2319 = vmatpush1.bf16.msra.mxu0 %v3532_v7  ;;  %v3564_v7 = vld [vmem:[#allocation7 + $0x154] ss:$8 sps:$4 sm:$0xff]  }
 0x14b   :  { %1820 = vmatpush1.bf16.msra.mxu1 %v3484_v54  ;;  %2320 = vmatprep.subr.bf16.mxu0 %v3537_v8  ;;  %v3562_v8 = vld [vmem:[#allocation7 + $0x150] ss:$8 sps:$4 sm:$0xff]  }
 0x14c   :  { %1821 = vmatprep.subr.bf16.mxu1 %v3489_v55 }
 0x14e   :  { %2321 = vmatpush1.bf16.msra.mxu0 %v3535_v9  ;;  %v3567_v9 = vld [vmem:[#allocation7 + $0x164] ss:$8 sps:$4 sm:$0xff]  }
 0x14f   :  { %1822 = vmatpush1.bf16.msra.mxu1 %v3487_v56  ;;  %2322 = vmatprep.subr.bf16.mxu0 %v3540_v10  ;;  %v3565_v10 = vld [vmem:[#allocation7 + $0x160] ss:$8 sps:$4 sm:$0xff]  }
 0x150   :  { %1823 = vmatprep.subr.bf16.mxu1 %v3492_v57 }
 0x151   :  { %v1675_v59 = vpop.f32.mrb[0].mxu1 }
 0x152   :  { %v1677_v60 = vpop.f32.mrb[1].mxu1  ;;  %2323 = vmatpush1.bf16.msra.mxu0 %v3538_v11  ;;  %v3570_v11 = vld [vmem:[#allocation7 + $0x174] ss:$8 sps:$4 sm:$0xff]  }
 0x153   :  { %v3942_v61 = vpop.f32.mrb[2].mxu1  ;;  %1824 = vmatpush1.bf16.msra.mxu1 %v3490_v0  ;;  %2324 = vmatprep.subr.bf16.mxu0 %v3543_v12  ;;  %v3568_v12 = vld [vmem:[#allocation7 + $0x170] ss:$8 sps:$4 sm:$0xff]  }
 0x154   :  { %v3944_v63 = vpop.f32.mrb[3].mxu1  ;;  %1825 = vmatprep.subr.bf16.mxu1 %v3495_v58 }
 0x156   :  { %2325 = vmatpush1.bf16.msra.mxu0 %v3541_v13  ;;  %v3573_v13 = vld [vmem:[#allocation7 + $0x184] ss:$8 sps:$4 sm:$0xff]  }
 0x157   :  { %1826 = vmatpush1.bf16.msra.mxu1 %v3493_v62  ;;  %2326 = vmatprep.subr.bf16.mxu0 %v3546_v14  ;;  %v3552_v62 = vld [vmem:[#allocation7 + $0x114] ss:$8 sps:$4 sm:$0xff]   ;;  %v3571_v14 = vld [vmem:[#allocation7 + $0x180] ss:$8 sps:$4 sm:$0xff]  }
 0x158   :  { %1827 = vmatprep.subr.bf16.mxu1 %v3498_v1  ;;  %v3555_v1 = vld [vmem:[#allocation7 + $0x124] ss:$8 sps:$4 sm:$0xff]  }
 0x15a   :  { %2327 = vmatpush1.bf16.msra.mxu0 %v3544_v15  ;;  %v346_v15 = vsub.s32 2, %v3946_v22 }
 0x15b   :  { %1828 = vmatpush1.bf16.msra.mxu1 %v3496_v2  ;;  %2339 = vmatprep.subr.bf16.mxu0 %v3549_v16  ;;  %v3553_v2 = vld [vmem:[#allocation7 + $0x120] ss:$8 sps:$4 sm:$0xff]   ;;  %v3576_v16 = vld [vmem:[#allocation7 + $0x194] ss:$8 sps:$4 sm:$0xff]  }
 0x15c   :  { %3045 = vmatprep.subr.bf16.mxu1 %v3595_v17  ;;  %v350_v17 = vsub.s32 3, %v3946_v22 }
 0x15e   :  { %1846 = vmatmul.mubr.bf16.vlgmr.msra.gmra.mrb[4].mxu1 %v3647_v3  ;;  %v3558_v3 = vld [vmem:[#allocation7 + $0x134] ss:$8 sps:$4 sm:$0xff]  }
 0x15f   :  { %3046 = vmatpush3.bf16.msra.mxu1 %v3596_v18  ;;  %v3574_v18 = vld [vmem:[#allocation7 + $0x190] ss:$8 sps:$4 sm:$0xff]  }
 0x160   :  { %3047 = vmatprep.subr.bf16.mxu1 %v3597_v19  ;;  %v347_v19 = vrot.slane %v3952_v24, %v346_v15  ;;  %v1964_v15 = vld [vmem:[%s4008_s4] sm:$0x3] }
 0x163   :  { %3048 = vmatpush3.bf16.msra.mxu1 %v3598_v20  ;;  %v351_v20 = vrot.slane %v3952_v24, %v350_v17  ;;  %v1973_v17 = vrot.slane %v1964_v15, %v342_v25 }
 0x1f0   :  { %v1632_v28 = vpop.f32.mrb[0].mxu0 }
 0x1f1   :  { %v3096_v29 = vadd.f32 %v1632_v28, %v339_v26  ;;  %v1634_v30 = vpop.f32.mrb[1].mxu0 }
 0x1f2   :  { %v3098_v31 = vadd.f32 %v1634_v30, %v343_v27  ;;  %v1636_v32 = vpop.f32.mrb[2].mxu0 }
 0x1f3   :  { %v3097_v33 = vadd.f32 %v3096_v29, %v1675_v59  ;;  %v3100_v34 = vadd.f32 %v1636_v32, %v339_v26  ;;  %v1638_v35 = vpop.f32.mrb[3].mxu0  ;;  %v3577_v29 = vld [vmem:[#allocation7 + $0x1a0] ss:$8 sps:$4 sm:$0xff]   ;;  %v3582_v32 = vld [vmem:[#allocation7 + $0x1b4] ss:$8 sps:$4 sm:$0xff]  }
 0x1f4   :  { %v3099_v36 = vadd.f32 %v3098_v31, %v1677_v60  ;;  %v3102_v37 = vadd.f32 %v1638_v35, %v343_v27 }
 0x1f5   :  { %v1864_v38 = vmul.f32 0.70710677, %v3097_v33  ;;  %v3101_v39 = vadd.f32 %v3100_v34, %v3942_v61  ;;  %v1856_v50 = vmul.f32 0.5, %v3097_v33  ;;  %v3547_v61 = vld [vmem:[#allocation7 + $0x100] ss:$8 sps:$4 sm:$0xff]  }
 0x1f6   :  { %v1865_v40 = vmul.f32 0.70710677, %v3099_v36  ;;  %v3103_v41 = vadd.f32 %v3102_v37, %v3944_v63  ;;  %v1857_v53 = vmul.f32 0.5, %v3099_v36  ;;  %v3550_v63 = vld [vmem:[#allocation7 + $0x110] ss:$8 sps:$4 sm:$0xff]  }
 0x1f7   :  { %3619 = verf.f32 %v1864_v38  ;;  %v1868_v42 = vmul.f32 0.70710677, %v3101_v39  ;;  %v1860_v51 = vmul.f32 0.5, %v3101_v39  ;;  %v3580_v39 = vld [vmem:[#allocation7 + $0x1b0] ss:$8 sps:$4 sm:$0xff]  }
 0x1f8   :  { %3621 = verf.f32 %v1865_v40  ;;  %v1869_v43 = vmul.f32 0.70710677, %v3103_v41  ;;  %v1861_v54 = vmul.f32 0.5, %v3103_v41  ;;  %v3585_v40 = vld [vmem:[#allocation7 + $0x1c4] ss:$8 sps:$4 sm:$0xff]  }
 0x1f9   :  { %3623 = verf.f32 %v1868_v42  ;;  %v3583_v41 = vld [vmem:[#allocation7 + $0x1c0] ss:$8 sps:$4 sm:$0xff]   ;;  %v3588_v42 = vld [vmem:[#allocation7 + $0x1d4] ss:$8 sps:$4 sm:$0xff]  }
 0x1fa   :  { %3625 = verf.f32 %v1869_v43  ;;  %v3586_v43 = vld [vmem:[#allocation7 + $0x1d0] ss:$8 sps:$4 sm:$0xff]  }
 0x201   :  { %v3620_v44 = vpop.eup %3619 }
 0x202   :  { %v3622_v45 = vpop.eup %3621  ;;  %v1880_v46 = vadd.f32 1.0, %v3620_v44  ;;  %v3591_v44 = vld [vmem:[#allocation7 + $0x1e4] ss:$8 sps:$4 sm:$0xff]  }
 0x203   :  { %v3624_v47 = vpop.eup %3623  ;;  %v1881_v48 = vadd.f32 1.0, %v3622_v45 }
 0x204   :  { %v3626_v49 = vpop.eup %3625  ;;  %v1884_v52 = vadd.f32 1.0, %v3624_v47  ;;  %v1888_v56 = vmul.f32 %v1880_v46, %v1856_v50  ;;  %v3589_v50 = vld [vmem:[#allocation7 + $0x1e0] ss:$8 sps:$4 sm:$0xff]  }
 0x205   :  { %v1885_v55 = vadd.f32 1.0, %v3626_v49  ;;  %v1889_v0 = vmul.f32 %v1881_v48, %v1857_v53 }
 0x206   :  { %v1892_v57 = vmul.f32 %v1884_v52, %v1860_v51 }
 0x207   :  { %v1893_v58 = vmul.f32 %v1885_v55, %v1861_v54  ;;  %v3594_v55 = vld [vmem:[#allocation7 + $0x1f4] ss:$8 sps:$4 sm:$0xff]  }
 0x208   :  { %v1896_v59 = vpack.c.bf16 %v1892_v57, %v1888_v56 }
 0x209   :  { %v1897_v60 = vpack.c.bf16 %v1893_v58, %v1889_v0 }
 0x20b   :  { %2328 = vmatprep.mubr.bf16.mxu0 %v1897_v60 }
 0x20c   :  { %2329 = vmatmul.mubr.bf16.vlgmr.msra.gmra.mrb[4].mxu0 %v1896_v59 }
 0x20d   :  { %2340 = vmatpush1.bf16.msra.mxu0 %v3547_v61 }
 0x20e   :  { %2341 = vmatprep.subr.bf16.mxu0 %v3552_v62  ;;  %v3592_v62 = vld [vmem:[#allocation7 + $0x1f0] ss:$8 sps:$4 sm:$0xff]  }
 0x211   :  { %2342 = vmatpush1.bf16.msra.mxu0 %v3550_v63 }
 0x212   :  { %2343 = vmatprep.subr.bf16.mxu0 %v3555_v1 }
 0x215   :  { %2344 = vmatpush1.bf16.msra.mxu0 %v3553_v2  ;;  %v3599_v2 = vld [vmem:[#allocation8 + $0x50] sm:$0xff]  }
 0x216   :  { %2345 = vmatprep.subr.bf16.mxu0 %v3558_v3  ;;  %v3600_v3 = vld [vmem:[#allocation8 + $0x10] sm:$0xff]   ;;  %3049 = vmatprep.subr.bf16.mxu1 %v3599_v2 }
 0x217   :  { %3050 = vmatpush3.bf16.msra.mxu1 %v3600_v3 }
 0x219   :  { %2346 = vmatpush1.bf16.msra.mxu0 %v3556_v4  ;;  %v3601_v4 = vld [vmem:[#allocation8 + $0x58] sm:$0xff]  }
 0x21a   :  { %2347 = vmatprep.subr.bf16.mxu0 %v3561_v5  ;;  %v3602_v5 = vld [vmem:[#allocation8 + $0x18] sm:$0xff]   ;;  %3051 = vmatprep.subr.bf16.mxu1 %v3601_v4 }
 0x21b   :  { %3052 = vmatpush3.bf16.msra.mxu1 %v3602_v5 }
 0x21d   :  { %2348 = vmatpush1.bf16.msra.mxu0 %v3559_v6  ;;  %v3603_v6 = vld [vmem:[#allocation8 + $0x60] sm:$0xff]  }
 0x21e   :  { %2349 = vmatprep.subr.bf16.mxu0 %v3564_v7  ;;  %v3604_v7 = vld [vmem:[#allocation8 + $0x20] sm:$0xff]   ;;  %3053 = vmatprep.subr.bf16.mxu1 %v3603_v6 }
 0x21f   :  { %3054 = vmatpush3.bf16.msra.mxu1 %v3604_v7 }
 0x221   :  { %2350 = vmatpush1.bf16.msra.mxu0 %v3562_v8  ;;  %v3605_v8 = vld [vmem:[#allocation8 + $0x68] sm:$0xff]  }
 0x222   :  { %2351 = vmatprep.subr.bf16.mxu0 %v3567_v9  ;;  %v3606_v9 = vld [vmem:[#allocation8 + $0x28] sm:$0xff]   ;;  %3055 = vmatprep.subr.bf16.mxu1 %v3605_v8 }
 0x223   :  { %3056 = vmatpush3.bf16.msra.mxu1 %v3606_v9 }
 0x225   :  { %2352 = vmatpush1.bf16.msra.mxu0 %v3565_v10  ;;  %v3607_v10 = vld [vmem:[#allocation8 + $0x70] sm:$0xff]  }
 0x226   :  { %2353 = vmatprep.subr.bf16.mxu0 %v3570_v11  ;;  %v3608_v11 = vld [vmem:[#allocation8 + $0x30] sm:$0xff]   ;;  %3057 = vmatprep.subr.bf16.mxu1 %v3607_v10 }
 0x227   :  { %3058 = vmatpush3.bf16.msra.mxu1 %v3608_v11 }
 0x229   :  { %2354 = vmatpush1.bf16.msra.mxu0 %v3568_v12  ;;  %v3609_v12 = vld [vmem:[#allocation8 + $0x78] sm:$0xff]  }
 0x22a   :  { %2355 = vmatprep.subr.bf16.mxu0 %v3573_v13  ;;  %v3610_v13 = vld [vmem:[#allocation8 + $0x38] sm:$0xff]   ;;  %3059 = vmatprep.subr.bf16.mxu1 %v3609_v12  ;;  %v3036_v12 = vld [vmem:[%s4012_s8] ss:$0 sm:$0xff] }
 0x22b   :  { %3060 = vmatpush3.bf16.msra.mxu1 %v3610_v13 }
 0x22d   :  { %2356 = vmatpush1.bf16.msra.mxu0 %v3571_v14  ;;  %v3802_v14 = vmov 0.0  }
 0x22e   :  { %2357 = vmatprep.subr.bf16.mxu0 %v3576_v16  ;;  %3076 = vmatprep.subr.bf16.mxu1 %v3802_v14  ;;  %v1969_v16 = vrot.slane %v1964_v15, %v338_v23 }
 0x231   :  { %v1847_v26 = vpop.f32.mrb[4].mxu1  ;;  %2358 = vmatpush1.bf16.msra.mxu0 %v3574_v18 }
 0x232   :  { %v3104_v27 = vadd.f32 %v1847_v26, %v347_v19  ;;  %v1849_v28 = vpop.f32.mrb[5].mxu1  ;;  %2359 = vmatprep.subr.bf16.mxu0 %v3579_v21 }
 0x233   :  { %v3105_v30 = vadd.f32 %v1849_v28, %v351_v20  ;;  %v1851_v31 = vpop.f32.mrb[6].mxu1 }
 0x234   :  { %v1866_v33 = vmul.f32 0.70710677, %v3104_v27  ;;  %v3106_v34 = vadd.f32 %v1851_v31, %v347_v19  ;;  %v1853_v35 = vpop.f32.mrb[7].mxu1  ;;  %v1858_v52 = vmul.f32 0.5, %v3104_v27 }
 0x235   :  { %v1867_v36 = vmul.f32 0.70710677, %v3105_v30  ;;  %v3107_v37 = vadd.f32 %v1853_v35, %v351_v20  ;;  %2360 = vmatpush1.bf16.msra.mxu0 %v3577_v29  ;;  %v1859_v56 = vmul.f32 0.5, %v3105_v30 }
 0x236   :  { %3627 = verf.f32 %v1866_v33  ;;  %v1870_v38 = vmul.f32 0.70710677, %v3106_v34  ;;  %2361 = vmatprep.subr.bf16.mxu0 %v3582_v32  ;;  %v1862_v53 = vmul.f32 0.5, %v3106_v34 }
 0x237   :  { %3629 = verf.f32 %v1867_v36  ;;  %v1871_v24 = vmul.f32 0.70710677, %v3107_v37  ;;  %v1863_v57 = vmul.f32 0.5, %v3107_v37 }
 0x238   :  { %3631 = verf.f32 %v1870_v38 }
 0x239   :  { %3633 = verf.f32 %v1871_v24  ;;  %2362 = vmatpush1.bf16.msra.mxu0 %v3580_v39 }
 0x23a   :  { %2363 = vmatprep.subr.bf16.mxu0 %v3585_v40 }
 0x23d   :  { %2364 = vmatpush1.bf16.msra.mxu0 %v3583_v41 }
 0x23e   :  { %2365 = vmatprep.subr.bf16.mxu0 %v3588_v42 }
 0x240   :  { %v3628_v45 = vpop.eup %3627 }
 0x241   :  { %v3630_v46 = vpop.eup %3629  ;;  %v1882_v47 = vadd.f32 1.0, %v3628_v45  ;;  %2366 = vmatpush1.bf16.msra.mxu0 %v3586_v43 }
 0x242   :  { %v3632_v48 = vpop.eup %3631  ;;  %v1883_v49 = vadd.f32 1.0, %v3630_v46  ;;  %2367 = vmatprep.subr.bf16.mxu0 %v3591_v44 }
 0x243   :  { %v3634_v51 = vpop.eup %3633  ;;  %v1886_v54 = vadd.f32 1.0, %v3632_v48  ;;  %v1890_v58 = vmul.f32 %v1882_v47, %v1858_v52  ;;  %v3611_v48 = vld [vmem:[#allocation10] sm:$0xff]  }
 0x244   :  { %v1887_v0 = vadd.f32 1.0, %v3634_v51  ;;  %v1891_v60 = vmul.f32 %v1883_v49, %v1859_v56  ;;  %v3612_v49 = vld [vmem:[#allocation10 + $0x8] sm:$0xff]   ;;  %v3614_v51 = vld [vmem:[#allocation10 + $0x18] sm:$0xff]   ;;  %v3615_v52 = vld [vmem:[#allocation10 + $0x20] sm:$0xff]  }
 0x245   :  { %v1894_v59 = vmul.f32 %v1886_v54, %v1862_v53  ;;  %2368 = vmatpush1.bf16.msra.mxu0 %v3589_v50  ;;  %v3613_v50 = vld [vmem:[#allocation10 + $0x10] sm:$0xff]   ;;  %v3616_v53 = vld [vmem:[#allocation10 + $0x28] sm:$0xff]  }
 0x246   :  { %v1895_v61 = vmul.f32 %v1887_v0, %v1863_v57  ;;  %2369 = vmatprep.subr.bf16.mxu0 %v3594_v55  ;;  %v3617_v54 = vld [vmem:[#allocation10 + $0x30] sm:$0xff]   ;;  %v3618_v55 = vld [vmem:[#allocation10 + $0x38] sm:$0xff]   ;;  %v3019_v57 = vld [vmem:[%s4010_s6] ss:$0 sm:$0xff] }
 0x247   :  { %v1898_v63 = vpack.c.bf16 %v1894_v59, %v1890_v58 }
 0x248   :  { %v1899_v1 = vpack.c.bf16 %v1895_v61, %v1891_v60 }
 0x249   :  { %2370 = vmatpush1.bf16.msra.mxu0 %v3592_v62 }
 0x24a   :  { %2371 = vmatprep.mubr.bf16.mxu0 %v1899_v1 }
 0x24c   :  { %2372 = vmatmul.mubr.bf16.vlgmr.msra.gmra.mrb[4].mxu0 %v1898_v63 }
 0x31f   :  { %v2373_v18 = vpop.f32.mrb[4].mxu0 }
 0x320   :  { %v3108_v19 = vadd.f32 %v2373_v18, %v1969_v16  ;;  %v2375_v20 = vpop.f32.mrb[5].mxu0 }
 0x321   :  { %v3109_v21 = vadd.f32 %v2375_v20, %v1973_v17  ;;  %v2377_v26 = vpop.f32.mrb[6].mxu0 }
 0x322   :  { %v2386_v27 = vmul.f32 0.70710677, %v3108_v19  ;;  %v3110_v28 = vadd.f32 %v2377_v26, %v1969_v16  ;;  %v2379_v29 = vpop.f32.mrb[7].mxu0  ;;  %v2382_v37 = vmul.f32 0.5, %v3108_v19 }
 0x323   :  { %v2387_v30 = vmul.f32 0.70710677, %v3109_v21  ;;  %v3111_v31 = vadd.f32 %v2379_v29, %v1973_v17  ;;  %v2383_v24 = vmul.f32 0.5, %v3109_v21 }
 0x324   :  { %3635 = verf.f32 %v2386_v27  ;;  %v2388_v32 = vmul.f32 0.70710677, %v3110_v28  ;;  %v2384_v38 = vmul.f32 0.5, %v3110_v28 }
 0x325   :  { %3637 = verf.f32 %v2387_v30  ;;  %v2389_v33 = vmul.f32 0.70710677, %v3111_v31  ;;  %v2385_v40 = vmul.f32 0.5, %v3111_v31 }
 0x326   :  { %3639 = verf.f32 %v2388_v32 }
 0x327   :  { %3641 = verf.f32 %v2389_v33 }
 0x32e   :  { %v3636_v23 = vpop.eup %3635 }
 0x32f   :  { %v3638_v34 = vpop.eup %3637  ;;  %v2394_v22 = vadd.f32 1.0, %v3636_v23 }
 0x330   :  { %v3640_v25 = vpop.eup %3639  ;;  %v2395_v35 = vadd.f32 1.0, %v3638_v34 }
 0x331   :  { %v3642_v36 = vpop.eup %3641  ;;  %v2396_v39 = vadd.f32 1.0, %v3640_v25  ;;  %v2398_v42 = vmul.f32 %v2394_v22, %v2382_v37 }
 0x332   :  { %v2397_v41 = vadd.f32 1.0, %v3642_v36  ;;  %v2399_v44 = vmul.f32 %v2395_v35, %v2383_v24 }
 0x333   :  { %v2400_v43 = vmul.f32 %v2396_v39, %v2384_v38 }
 0x334   :  { %v2401_v45 = vmul.f32 %v2397_v41, %v2385_v40 }
 0x335   :  { %v2402_v46 = vpack.c.bf16 %v2400_v43, %v2398_v42 }
 0x336   :  { %v2403_v47 = vpack.c.bf16 %v2401_v45, %v2399_v44 }
 0x338   :  { %2571 = vmatprep.mubr.bf16.mxu1 %v2403_v47 }
 0x339   :  { %2572 = vmatmul.mubr.bf16.vlgmr.msra.gmra.mrb[8].mxu1 %v2402_v46 }
 0x33a   :  { %3077 = vmatpush3.bf16.msra.mxu1 %v3611_v48  ;;  %3092 = vmatprep.mubr.msk.bf16.mxu1 %vm3803_vm0, %v3802_v14 }
 0x33b   :  { %3078 = vmatprep.subr.bf16.mxu1 %v3802_v14 }
 0x33e   :  { %3079 = vmatpush3.bf16.msra.mxu1 %v3612_v49 }
 0x33f   :  { %3080 = vmatprep.subr.bf16.mxu1 %v3802_v14 }
 0x342   :  { %3081 = vmatpush3.bf16.msra.mxu1 %v3613_v50 }
 0x343   :  { %3082 = vmatprep.subr.bf16.mxu1 %v3802_v14 }
 0x346   :  { %3083 = vmatpush3.bf16.msra.mxu1 %v3614_v51 }
 0x347   :  { %3084 = vmatprep.subr.bf16.mxu1 %v3802_v14 }
 0x34a   :  { %3085 = vmatpush3.bf16.msra.mxu1 %v3615_v52 }
 0x34b   :  { %3086 = vmatprep.subr.bf16.mxu1 %v3802_v14 }
 0x34e   :  { %3087 = vmatpush3.bf16.msra.mxu1 %v3616_v53 }
 0x34f   :  { %3088 = vmatprep.subr.bf16.mxu1 %v3802_v14 }
 0x352   :  { %3089 = vmatpush3.bf16.msra.mxu1 %v3617_v54 }
 0x353   :  { %3090 = vmatprep.subr.bf16.mxu1 %v3802_v14 }
 0x356   :  { %3091 = vmatpush3.bf16.msra.mxu1 %v3618_v55 }
 0x40c   :  { %v3061_v56 = vpop.f32.mrb[8].mxu1 }
 0x40d   :  { %v3062_v0 = vpop.f32.mrb[9].mxu1 }
 0x40e   :  { %v3063_v58 = vadd.f32 %v3062_v0, %v3061_v56  ;;  %v3064_v59 = vpop.f32.mrb[10].mxu1 }
 0x40f   :  { %v3065_v60 = vpop.f32.mrb[11].mxu1 }
 0x410   :  { %v2574_v61 = vadd.f32 %v3063_v58, %v3019_v57  ;;  %v3066_v62 = vadd.f32 %v3065_v60, %v3064_v59 }
 0x412   :  { %v2582_v63 = vmul.f32 0.70710677, %v2574_v61  ;;  %v2577_v1 = vadd.f32 %v3066_v62, %v3019_v57  ;;  %v2580_v6 = vmul.f32 0.5, %v2574_v61 }
 0x414   :  { %3643 = verf.f32 %v2582_v63  ;;  %v2583_v2 = vmul.f32 0.70710677, %v2577_v1  ;;  %v2581_v7 = vmul.f32 0.5, %v2577_v1 }
 0x416   :  { %3645 = verf.f32 %v2583_v2 }
 0x41e   :  { %v3644_v3 = vpop.eup %3643 }
 0x41f   :  { %v2586_v4 = vadd.f32 1.0, %v3644_v3 }
 0x420   :  { %v3646_v5 = vpop.eup %3645 }
 0x421   :  { %v2587_v8 = vadd.f32 1.0, %v3646_v5  ;;  %v2588_v9 = vmul.f32 %v2586_v4, %v2580_v6 }
 0x423   :  { %v2589_v10 = vmul.f32 %v2587_v8, %v2581_v7 }
 0x425   :  { %v2590_v11 = vpack.c.bf16 %v2589_v10, %v2588_v9 }
 0x427   :  { %3093 = vmatmul.mubr.bf16.vlgmr.msra.gmra.mrb[12].mxu1 %v2590_v11 }
 0x4fa   :  { %v2696_v13 = vpop.f32.mrb[12].mxu1 }
 0x4fb   :  { %v2697_v14 = vadd.f32 %v3036_v12, %v2696_v13  ;;  %v3094_v15 = vpop.f32.mrb[13].mxu1 }
 0x4fc   :  { %v2699_v16 = vpop.f32.mrb[14].mxu1 }
 0x4fd   :  { %2703 = vst [vmem:[#allocation11] sm:$0xff] %v2697_v14  ;;  %v2700_v17 = vadd.f32 %v3036_v12, %v2699_v16  ;;  %v3095_v18 = vpop.f32.mrb[15].mxu1 }
 0x4ff   :  { %2704 = vst [vmem:[#allocation11 + $0x8] sm:$0xff] %v2700_v17 }
 0x500   :  { %3769 = shalt.err (!%p3766_p2)
}
 0x501   :  { %s3770_s18 = scalar_lea.hbm %s4013_s9, 256 }
 0x502   :  { %p3771_p3 = scmp.ne.s32.totalorder %s4013_s9, %s3770_s18  ;;  %p3774_p4 = scmp.lt.u32.totalorder %s3770_s18, %s4013_s9 }
 0x504   :  { %p3776_p5 = pnand %p3774_p4, %p3771_p3 }
 0x506   :  { %3779 = shalt.err (!%p3776_p5)
}
 0x507   :  { %2716 = dma.vmem_to_hbm [thread:$0]  %s2711_s14, 256, %s4013_s9, [#allocation4], %s3798_s0, %s3798_s0, %s3799_s16  }
 0x508   :  { %3786 = dma.done.wait [#allocation4], 256  }
 0x509   :  { %3787 = vsyncadd [#allocation4], 4294967040 }
 0x50a   :  { %2720 = vsyncpa [#allocation3], 1 }
 0x50b   :  { %2721 = vsyncpa [#allocation6], 1 }
 0x50c   :  { %2722 = vsyncpa [#allocation9], 1 }
 0x50d   :  { %2723 = vsyncpa [#allocation4], 1 }

</bundles_post_ra>
